<compile_context>
chip_gen: v6e
topology: v6e:2x2x1
jax: 0.10.0
libtpu: 0.0.40
codegen_flags: <defaults>
</compile_context>

<pallas_src>
import functools

import jax
import jax.numpy as jnp
from jax import lax
from jax.experimental import pallas as pl
from jax.experimental.pallas import tpu as pltpu

_F32 = jnp.float32
_BF16 = jnp.bfloat16


def _binarize(v):
    return jnp.tanh(2.0 * v)


# ---------------------------------------------------------------------------
# Kernel
# ---------------------------------------------------------------------------
def _bitmixer_block_kernel(x_ref, w1_ref, b1_ref, w2_ref, b2_ref,
                           w3t_ref, b3_ref, w4t_ref, b4_ref,
                           o_ref, u_scr):
    bt, L, E = x_ref.shape

    # Weights arrive binarized + bf16 (MXU-native); biases binarized f32.
    w1 = w1_ref[...]          # (3E, L)  bf16
    b1 = b1_ref[...]          # (3E, 1)  f32
    w2 = w2_ref[...]          # (L, 3E)  bf16
    b2 = b2_ref[...]          # (L, 1)   f32

    # --- Token-mixing pair, per batch element ------------------------------
    # Kept in transposed form (W1 @ x, W2 @ zt) so no in-kernel transposes are
    # needed and the residual add with x needs no rearrange.  fori_loop (not
    # an unrolled Python for) bounds the (3E, E) intermediate's live range to
    # a single iteration.
    def token_mix(i, carry):
        x = x_ref[i]                                                   # (L, E) f32
        zt = _binarize(jnp.dot(w1, x.astype(_BF16),
                               preferred_element_type=_F32) + b1)      # (3E, E)
        z2 = _binarize(jnp.dot(w2, zt.astype(_BF16),
                               preferred_element_type=_F32) + b2)      # (L, E)
        u_scr[i] = _binarize(z2 + x)                                   # (L, E)
        return carry

    lax.fori_loop(0, bt, token_mix, 0)

    # --- Channel-mixing pair, batched over the whole block ------------------
    # M = bt*L: w3/w4 are staged into the MXU once per grid step, b3/b4 are
    # broadcast-added once, and the output is a single lane-dense store.
    u_all = u_scr[...].reshape(bt * L, E)                              # f32
    z3 = _binarize(jnp.dot(u_all.astype(_BF16), w3t_ref[...],
                           preferred_element_type=_F32) + b3_ref[...])  # (bt*L, 3E)
    z4 = jnp.dot(z3.astype(_BF16), w4t_ref[...],
                 preferred_element_type=_F32) + b4_ref[...]             # (bt*L, E)
    o_ref[...] = _binarize(z4 + u_all).reshape(bt, L, E).astype(o_ref.dtype)


# ---------------------------------------------------------------------------
# Sizing helpers (generation-aware)
# ---------------------------------------------------------------------------
def _tpu_vmem_capacity_bytes():
    try:
        return int(pltpu.get_tpu_info().vmem_capacity_bytes)
    except Exception:  # interpret mode / older runtime: assume smallest (v7x)
        return 64 * 1024 * 1024


def _pick_batch_tile(B, L, E, *, budget_bytes, num_cores, weight_buffers):
    """Largest batch tile that (a) divides B, (b) fits the VMEM budget with
    bf16 weights and the requested weight buffer count, and (c) keeps the
    grid extent a multiple of the TensorCore count (load balance on v7x)."""
    f32, bf16 = 4, 2
    weight_bytes = weight_buffers * (
        2 * (3 * E * L) * bf16           # w1 (3E,L) + w2 (L,3E)
        + 2 * (3 * E * E) * bf16         # w3t (E,3E) + w4t (3E,E)
        + (3 * E + L + 3 * E + E) * f32  # biases
    )
    # Token-mix intermediates live one fori_loop iteration at a time.
    fixed_bytes = weight_bytes + (3 * E * E) * (f32 + bf16) + 2 * L * E * f32
    per_b = (
        2 * 2 * L * E * f32              # double-buffered input + output tiles
        + L * E * f32                    # u scratch
        + L * E * (f32 + bf16)           # u_all (+ bf16 cast)
        + L * 3 * E * (f32 + bf16)       # z3 (+ bf16 cast)
        + L * E * f32                    # z4
    )
    best = 1
    for cand in range(1, B + 1):
        if B % cand:
            continue
        steps = B // cand
        if num_cores > 1 and steps % num_cores:
            continue  # keep the grid even so both v7x TensorCores stay busy
        if fixed_bytes + cand * per_b <= budget_bytes:
            best = cand
    return best


# ---------------------------------------------------------------------------
# Wrapper
# ---------------------------------------------------------------------------
def bitmixer_block(x, raw_params, *, batch_tile=None, single_buffer_weights=True,
                   vmem_limit_bytes=None):
    """Apply one BitMixerBlock. x: (B, L, E) float32. raw_params are the
    nn.Linear-convention (weight, bias) arrays for linear_1..linear_4."""
    B, L, E = x.shape
    w1, b1, w2, b2, w3, b3, w4, b4 = raw_params
    bz = _binarize

    # Hoist ALL weight/bias binarization out of the kernel; store the matmul
    # operands in bf16 (MXU-native), keep biases f32 (added to f32 accums).
    w1b = bz(w1).astype(_BF16)                # (3E, L)
    b1b = bz(b1).reshape(3 * E, 1)
    w2b = bz(w2).astype(_BF16)                # (L, 3E)
    b2b = bz(b2).reshape(L, 1)
    w3tb = bz(w3).T.astype(_BF16)             # (E, 3E)
    b3b = bz(b3).reshape(1, 3 * E)
    w4tb = bz(w4).T.astype(_BF16)             # (3E, E)
    b4b = bz(b4).reshape(1, E)

    vmem_cap = _tpu_vmem_capacity_bytes()
    if vmem_limit_bytes is None:
        vmem_limit_bytes = int(0.75 * vmem_cap)
    # Heuristic: 64 MiB-class VMEM => v7x-style chip with 2 TensorCores.
    num_cores = 2 if vmem_cap <= 96 * 1024 * 1024 else 1

    bt = batch_tile if batch_tile is not None else _pick_batch_tile(
        B, L, E,
        budget_bytes=int(0.70 * vmem_cap),
        num_cores=num_cores,
        weight_buffers=1 if single_buffer_weights else 2)
    assert B % bt == 0, f"batch {B} not divisible by batch tile {bt}"

    def weight_spec(arr):
        shape = arr.shape
        idx_map = lambda b: (0,) * len(shape)
        if single_buffer_weights:
            # Grid-invariant block: a second pipeline buffer is pure VMEM waste.
            return pl.BlockSpec(shape, idx_map, pipeline_mode=pl.Buffered(1))
        return pl.BlockSpec(shape, idx_map)

    return pl.pallas_call(
        _bitmixer_block_kernel,
        out_shape=jax.ShapeDtypeStruct((B, L, E), x.dtype),
        grid_spec=pltpu.PrefetchScalarGridSpec(
            num_scalar_prefetch=0,
            grid=(B // bt,),
            in_specs=[
                pl.BlockSpec((bt, L, E), lambda b: (b, 0, 0)),
                weight_spec(w1b), weight_spec(b1b),
                weight_spec(w2b), weight_spec(b2b),
                weight_spec(w3tb), weight_spec(b3b),
                weight_spec(w4tb), weight_spec(b4b),
            ],
            out_specs=pl.BlockSpec((bt, L, E), lambda b: (b, 0, 0)),
            scratch_shapes=[pltpu.VMEM((bt, L, E), jnp.float32)],
        ),
        compiler_params=pltpu.CompilerParams(
            dimension_semantics=("parallel",),
            vmem_limit_bytes=vmem_limit_bytes),
    )(x, w1b, b1b, w2b, b2b, w3tb, b3b, w4tb, b4b)


def bitmixer_forward(x, all_params, *, single_buffer_weights=True):
    for params in all_params:
        x = bitmixer_block(x, params, single_buffer_weights=single_buffer_weights)
    return x


def run_forward(x, all_params):
    """Jitted forward.  Falls back to default (double-buffered) weight specs
    if the installed JAX/Mosaic rejects pipeline_mode=pl.Buffered(1)."""
    last_err = None
    for single_buffer in (True, False):
        try:
            fwd = jax.jit(functools.partial(
                bitmixer_forward, single_buffer_weights=single_buffer))
            return jax.block_until_ready(fwd(x, all_params))
        except Exception as e:  # pragma: no cover - version-dependent fallback
            last_err = e
    raise last_err


# ---------------------------------------------------------------------------
# Params / reference
# ---------------------------------------------------------------------------
def init_block_params(key, *, embedding_dimension, sequence_length):
    """Deterministic init mimicking nn.Linear (weight: (out, in), bias: (out,)).

    linear_1: L -> 3E, linear_2: 3E -> L, linear_3: E -> 3E, linear_4: 3E -> E.
    """
    E, L = embedding_dimension, sequence_length
    ks = jax.random.split(key, 8)

    def uni(k, shape, fan_in):
        bound = 1.0 / jnp.sqrt(float(fan_in))
        return jax.random.uniform(k, shape, jnp.float32, -bound, bound)

    w1 = uni(ks[0], (3 * E, L), L)
    b1 = uni(ks[1], (3 * E,), L)
    w2 = uni(ks[2], (L, 3 * E), 3 * E)
    b2 = uni(ks[3], (L,), 3 * E)
    w3 = uni(ks[4], (3 * E, E), E)
    b3 = uni(ks[5], (3 * E,), E)
    w4 = uni(ks[6], (E, 3 * E), 3 * E)
    b4 = uni(ks[7], (E,), 3 * E)
    return (w1, b1, w2, b2, w3, b3, w4, b4)


def _reference_block(x, raw_params):
    """Pure-JAX transcription of the PyTorch BitMixerBlock.forward, using the
    same bf16 matmul operands / f32 accumulation the kernel uses."""
    w1, b1, w2, b2, w3, b3, w4, b4 = raw_params
    bz = _binarize

    def mm(a, w):  # a @ binarize(w).T with bf16 operands, f32 accumulation
        wt = bz(w).T.astype(_BF16)
        return lax.dot_general(a.astype(_BF16), wt,
                               dimension_numbers=(((2,), (0,)), ((), ())),
                               preferred_element_type=jnp.float32)

    z = jnp.swapaxes(x, 1, 2)                  # b l e -> b e l
    z = bz(mm(z, w1) + bz(b1))
    z = bz(mm(z, w2) + bz(b2))
    u = bz(jnp.swapaxes(z, 1, 2) + x)          # b e l -> b l e
    z = bz(mm(u, w3) + bz(b3))
    z = mm(z, w4) + bz(b4)
    return bz(z + u)


if __name__ == "__main__":
    # Small config: B=4, sequence_length=8, embedding_dimension=32, layers=2.
    B, L, E, LAYERS = 4, 8, 32, 2

    key = jax.random.PRNGKey(0)
    key_x, key_p = jax.random.split(key)
    x = jax.random.normal(key_x, (B, L, E), jnp.float32)

    layer_keys = jax.random.split(key_p, LAYERS)
    all_params = tuple(
        init_block_params(k, embedding_dimension=E, sequence_length=L)
        for k in layer_keys
    )

    out = run_forward(x, all_params)
    assert out.shape == (B, L, E)

    # Sanity check against a pure-JAX reference (same bf16 dot operands).
    ref = x
    for p in all_params:
        ref = _reference_block(ref, p)
    ref = jax.block_until_ready(ref)
    max_diff = float(jnp.max(jnp.abs(out - ref)))
    assert jnp.allclose(out, ref, atol=2e-2, rtol=0.0), (
        f"mismatch vs reference, max|diff|={max_diff}")

    print("KERNEL_OK")
</pallas_src>

<mosaic_0001>
module attributes {stable_mosaic.version = 11 : i64} {
  func.func @_bitmixer_block_kernel(%arg0: i32, %arg1: memref<2x8x32xf32, #tpu.memory_space<vmem>>, %arg2: memref<96x8xbf16, #tpu.memory_space<vmem>>, %arg3: memref<96x1xf32, #tpu.memory_space<vmem>>, %arg4: memref<8x96xbf16, #tpu.memory_space<vmem>>, %arg5: memref<8x1xf32, #tpu.memory_space<vmem>>, %arg6: memref<32x96xbf16, #tpu.memory_space<vmem>>, %arg7: memref<1x96xf32, #tpu.memory_space<vmem>>, %arg8: memref<96x32xbf16, #tpu.memory_space<vmem>>, %arg9: memref<1x32xf32, #tpu.memory_space<vmem>>, %arg10: memref<2x8x32xf32, #tpu.memory_space<vmem>>, %arg11: memref<2x8x32xf32, #tpu.memory_space<vmem>>) attributes {dimension_semantics = [#tpu.dimension_semantics<parallel>], iteration_bounds = array<i64: 2>, scalar_prefetch = 0 : i64, scratch_operands = 1 : i64, tpu.core_type = #tpu.core_type<tc>, window_params = [{transform_indices = @transform_0, window_bounds = array<i64: 2, 8, 32>}, {pipeline_mode = #tpu.pipeline_mode<synchronous>, transform_indices = @transform_1, window_bounds = array<i64: 96, 8>}, {pipeline_mode = #tpu.pipeline_mode<synchronous>, transform_indices = @transform_2, window_bounds = array<i64: 96, 1>}, {pipeline_mode = #tpu.pipeline_mode<synchronous>, transform_indices = @transform_3, window_bounds = array<i64: 8, 96>}, {pipeline_mode = #tpu.pipeline_mode<synchronous>, transform_indices = @transform_4, window_bounds = array<i64: 8, 1>}, {pipeline_mode = #tpu.pipeline_mode<synchronous>, transform_indices = @transform_5, window_bounds = array<i64: 32, 96>}, {pipeline_mode = #tpu.pipeline_mode<synchronous>, transform_indices = @transform_6, window_bounds = array<i64: 1, 96>}, {pipeline_mode = #tpu.pipeline_mode<synchronous>, transform_indices = @transform_7, window_bounds = array<i64: 96, 32>}, {pipeline_mode = #tpu.pipeline_mode<synchronous>, transform_indices = @transform_8, window_bounds = array<i64: 1, 32>}, {transform_indices = @transform_9, window_bounds = array<i64: 2, 8, 32>}]} {
    %c0 = arith.constant 0 : index
    %c0_0 = arith.constant 0 : index
    %0 = vector.load %arg2[%c0, %c0_0] : memref<96x8xbf16, #tpu.memory_space<vmem>>, vector<96x8xbf16>
    %c0_1 = arith.constant 0 : index
    %c0_2 = arith.constant 0 : index
    %1 = vector.load %arg3[%c0_1, %c0_2] : memref<96x1xf32, #tpu.memory_space<vmem>>, vector<96x1xf32>
    %c0_3 = arith.constant 0 : index
    %c0_4 = arith.constant 0 : index
    %2 = vector.load %arg4[%c0_3, %c0_4] : memref<8x96xbf16, #tpu.memory_space<vmem>>, vector<8x96xbf16>
    %c0_5 = arith.constant 0 : index
    %c0_6 = arith.constant 0 : index
    %3 = vector.load %arg5[%c0_5, %c0_6] : memref<8x1xf32, #tpu.memory_space<vmem>>, vector<8x1xf32>
    %c0_i32 = arith.constant 0 : i32
    %c2_i32 = arith.constant 2 : i32
    %4 = arith.addi %c0_i32, %c2_i32 : i32
    %c1_i32 = arith.constant 1 : i32
    scf.for %arg12 = %c0_i32 to %4 step %c1_i32  : i32 {
      %28 = arith.index_cast %arg12 : i32 to index
      %c0_25 = arith.constant 0 : index
      %c0_26 = arith.constant 0 : index
      %29 = vector.load %arg1[%28, %c0_25, %c0_26] : memref<2x8x32xf32, #tpu.memory_space<vmem>>, vector<1x8x32xf32>
      %30 = vector.shape_cast %29 : vector<1x8x32xf32> to vector<8x32xf32>
      %31 = arith.truncf %30 : vector<8x32xf32> to vector<8x32xbf16>
      %cst_27 = arith.constant dense<0.000000e+00> : vector<96x32xf32>
      %32 = tpu.matmul %0, %31, %cst_27 {dimension_numbers = #tpu.dot_dimension_numbers<[1], [0], [0], [1], [0, 0, 1, 1], [], []>} : vector<96x8xbf16>, vector<8x32xbf16>, vector<96x32xf32> -> vector<96x32xf32>
      %33 = vector.broadcast %1 : vector<96x1xf32> to vector<96x32xf32>
      %34 = arith.addf %32, %33 : vector<96x32xf32>
      %cst_28 = arith.constant 2.000000e+00 : f32
      %35 = vector.broadcast %cst_28 : f32 to vector<96x32xf32>
      %36 = arith.mulf %35, %34 : vector<96x32xf32>
      %37 = math.tanh %36 : vector<96x32xf32>
      %38 = arith.truncf %37 : vector<96x32xf32> to vector<96x32xbf16>
      %cst_29 = arith.constant dense<0.000000e+00> : vector<8x32xf32>
      %39 = tpu.matmul %2, %38, %cst_29 {dimension_numbers = #tpu.dot_dimension_numbers<[1], [0], [0], [1], [0, 0, 1, 1], [], []>} : vector<8x96xbf16>, vector<96x32xbf16>, vector<8x32xf32> -> vector<8x32xf32>
      %40 = vector.broadcast %3 : vector<8x1xf32> to vector<8x32xf32>
      %41 = arith.addf %39, %40 : vector<8x32xf32>
      %cst_30 = arith.constant 2.000000e+00 : f32
      %42 = vector.broadcast %cst_30 : f32 to vector<8x32xf32>
      %43 = arith.mulf %42, %41 : vector<8x32xf32>
      %44 = math.tanh %43 : vector<8x32xf32>
      %45 = arith.addf %44, %30 : vector<8x32xf32>
      %cst_31 = arith.constant 2.000000e+00 : f32
      %46 = vector.broadcast %cst_31 : f32 to vector<8x32xf32>
      %47 = arith.mulf %46, %45 : vector<8x32xf32>
      %48 = math.tanh %47 : vector<8x32xf32>
      %49 = arith.index_cast %arg12 : i32 to index
      %c0_32 = arith.constant 0 : index
      %c0_33 = arith.constant 0 : index
      %50 = vector.load %arg11[%49, %c0_32, %c0_33] : memref<2x8x32xf32, #tpu.memory_space<vmem>>, vector<1x8x32xf32>
      %51 = vector.shape_cast %50 : vector<1x8x32xf32> to vector<8x32xf32>
      %52 = vector.shape_cast %48 : vector<8x32xf32> to vector<1x8x32xf32>
      tpu.vector_store %arg11[%49, %c0_32, %c0_33], %52 {strides = array<i32>} : memref<2x8x32xf32, #tpu.memory_space<vmem>>, vector<1x8x32xf32>,
    }
    %c2_i32_7 = arith.constant 2 : i32
    %c0_8 = arith.constant 0 : index
    %c0_9 = arith.constant 0 : index
    %c0_10 = arith.constant 0 : index
    %5 = vector.load %arg11[%c0_8, %c0_9, %c0_10] : memref<2x8x32xf32, #tpu.memory_space<vmem>>, vector<2x8x32xf32>
    %6 = vector.shape_cast %5 : vector<2x8x32xf32> to vector<16x32xf32>
    %7 = arith.truncf %6 : vector<16x32xf32> to vector<16x32xbf16>
    %c0_11 = arith.constant 0 : index
    %c0_12 = arith.constant 0 : index
    %8 = vector.load %arg6[%c0_11, %c0_12] : memref<32x96xbf16, #tpu.memory_space<vmem>>, vector<32x96xbf16>
    %cst = arith.constant dense<0.000000e+00> : vector<16x96xf32>
    %9 = tpu.matmul %7, %8, %cst {dimension_numbers = #tpu.dot_dimension_numbers<[1], [0], [0], [1], [0, 0, 1, 1], [], []>} : vector<16x32xbf16>, vector<32x96xbf16>, vector<16x96xf32> -> vector<16x96xf32>
    %c0_13 = arith.constant 0 : index
    %c0_14 = arith.constant 0 : index
    %10 = vector.load %arg7[%c0_13, %c0_14] : memref<1x96xf32, #tpu.memory_space<vmem>>, vector<1x96xf32>
    %11 = vector.broadcast %10 : vector<1x96xf32> to vector<16x96xf32>
    %12 = arith.addf %9, %11 : vector<16x96xf32>
    %cst_15 = arith.constant 2.000000e+00 : f32
    %13 = vector.broadcast %cst_15 : f32 to vector<16x96xf32>
    %14 = arith.mulf %13, %12 : vector<16x96xf32>
    %15 = math.tanh %14 : vector<16x96xf32>
    %16 = arith.truncf %15 : vector<16x96xf32> to vector<16x96xbf16>
    %c0_16 = arith.constant 0 : index
    %c0_17 = arith.constant 0 : index
    %17 = vector.load %arg8[%c0_16, %c0_17] : memref<96x32xbf16, #tpu.memory_space<vmem>>, vector<96x32xbf16>
    %cst_18 = arith.constant dense<0.000000e+00> : vector<16x32xf32>
    %18 = tpu.matmul %16, %17, %cst_18 {dimension_numbers = #tpu.dot_dimension_numbers<[1], [0], [0], [1], [0, 0, 1, 1], [], []>} : vector<16x96xbf16>, vector<96x32xbf16>, vector<16x32xf32> -> vector<16x32xf32>
    %c0_19 = arith.constant 0 : index
    %c0_20 = arith.constant 0 : index
    %19 = vector.load %arg9[%c0_19, %c0_20] : memref<1x32xf32, #tpu.memory_space<vmem>>, vector<1x32xf32>
    %20 = vector.broadcast %19 : vector<1x32xf32> to vector<16x32xf32>
    %21 = arith.addf %18, %20 : vector<16x32xf32>
    %22 = arith.addf %21, %6 : vector<16x32xf32>
    %cst_21 = arith.constant 2.000000e+00 : f32
    %23 = vector.broadcast %cst_21 : f32 to vector<16x32xf32>
    %24 = arith.mulf %23, %22 : vector<16x32xf32>
    %25 = math.tanh %24 : vector<16x32xf32>
    %26 = vector.shape_cast %25 : vector<16x32xf32> to vector<2x8x32xf32>
    %c0_22 = arith.constant 0 : index
    %c0_23 = arith.constant 0 : index
    %c0_24 = arith.constant 0 : index
    %27 = vector.load %arg10[%c0_22, %c0_23, %c0_24] : memref<2x8x32xf32, #tpu.memory_space<vmem>>, vector<2x8x32xf32>
    tpu.vector_store %arg10[%c0_22, %c0_23, %c0_24], %26 {strides = array<i32>} : memref<2x8x32xf32, #tpu.memory_space<vmem>>, vector<2x8x32xf32>,
    return
  }
  func.func @transform_0(%arg0: i32) -> (i32, i32, i32) {
    %c0_i32 = arith.constant 0 : i32
    %c0_i32_0 = arith.constant 0 : i32
    %c0_i32_1 = arith.constant 0 : i32
    return %arg0, %c0_i32, %c0_i32_0 : i32, i32, i32
  }
  func.func @transform_1(%arg0: i32) -> (i32, i32) {
    %c0_i32 = arith.constant 0 : i32
    %c0_i32_0 = arith.constant 0 : i32
    %c0_i32_1 = arith.constant 0 : i32
    return %c0_i32, %c0_i32_0 : i32, i32
  }
  func.func @transform_2(%arg0: i32) -> (i32, i32) {
    %c0_i32 = arith.constant 0 : i32
    %c0_i32_0 = arith.constant 0 : i32
    %c0_i32_1 = arith.constant 0 : i32
    return %c0_i32, %c0_i32_0 : i32, i32
  }
  func.func @transform_3(%arg0: i32) -> (i32, i32) {
    %c0_i32 = arith.constant 0 : i32
    %c0_i32_0 = arith.constant 0 : i32
    %c0_i32_1 = arith.constant 0 : i32
    return %c0_i32, %c0_i32_0 : i32, i32
  }
  func.func @transform_4(%arg0: i32) -> (i32, i32) {
    %c0_i32 = arith.constant 0 : i32
    %c0_i32_0 = arith.constant 0 : i32
    %c0_i32_1 = arith.constant 0 : i32
    return %c0_i32, %c0_i32_0 : i32, i32
  }
  func.func @transform_5(%arg0: i32) -> (i32, i32) {
    %c0_i32 = arith.constant 0 : i32
    %c0_i32_0 = arith.constant 0 : i32
    %c0_i32_1 = arith.constant 0 : i32
    return %c0_i32, %c0_i32_0 : i32, i32
  }
  func.func @transform_6(%arg0: i32) -> (i32, i32) {
    %c0_i32 = arith.constant 0 : i32
    %c0_i32_0 = arith.constant 0 : i32
    %c0_i32_1 = arith.constant 0 : i32
    return %c0_i32, %c0_i32_0 : i32, i32
  }
  func.func @transform_7(%arg0: i32) -> (i32, i32) {
    %c0_i32 = arith.constant 0 : i32
    %c0_i32_0 = arith.constant 0 : i32
    %c0_i32_1 = arith.constant 0 : i32
    return %c0_i32, %c0_i32_0 : i32, i32
  }
  func.func @transform_8(%arg0: i32) -> (i32, i32) {
    %c0_i32 = arith.constant 0 : i32
    %c0_i32_0 = arith.constant 0 : i32
    %c0_i32_1 = arith.constant 0 : i32
    return %c0_i32, %c0_i32_0 : i32, i32
  }
  func.func @transform_9(%arg0: i32) -> (i32, i32, i32) {
    %c0_i32 = arith.constant 0 : i32
    %c0_i32_0 = arith.constant 0 : i32
    %c0_i32_1 = arith.constant 0 : i32
    return %arg0, %c0_i32, %c0_i32_0 : i32, i32, i32
  }
}

module attributes {stable_mosaic.version = 11 : i64} {
  func.func @_bitmixer_block_kernel(%arg0: i32, %arg1: memref<2x8x32xf32, #tpu.memory_space<vmem>>, %arg2: memref<96x8xbf16, #tpu.memory_space<vmem>>, %arg3: memref<96x1xf32, #tpu.memory_space<vmem>>, %arg4: memref<8x96xbf16, #tpu.memory_space<vmem>>, %arg5: memref<8x1xf32, #tpu.memory_space<vmem>>, %arg6: memref<32x96xbf16, #tpu.memory_space<vmem>>, %arg7: memref<1x96xf32, #tpu.memory_space<vmem>>, %arg8: memref<96x32xbf16, #tpu.memory_space<vmem>>, %arg9: memref<1x32xf32, #tpu.memory_space<vmem>>, %arg10: memref<2x8x32xf32, #tpu.memory_space<vmem>>, %arg11: memref<2x8x32xf32, #tpu.memory_space<vmem>>) attributes {dimension_semantics = [#tpu.dimension_semantics<parallel>], iteration_bounds = array<i64: 2>, scalar_prefetch = 0 : i64, scratch_operands = 1 : i64, tpu.core_type = #tpu.core_type<tc>, window_params = [{transform_indices = @transform_0, window_bounds = array<i64: 2, 8, 32>}, {pipeline_mode = #tpu.pipeline_mode<synchronous>, transform_indices = @transform_1, window_bounds = array<i64: 96, 8>}, {pipeline_mode = #tpu.pipeline_mode<synchronous>, transform_indices = @transform_2, window_bounds = array<i64: 96, 1>}, {pipeline_mode = #tpu.pipeline_mode<synchronous>, transform_indices = @transform_3, window_bounds = array<i64: 8, 96>}, {pipeline_mode = #tpu.pipeline_mode<synchronous>, transform_indices = @transform_4, window_bounds = array<i64: 8, 1>}, {pipeline_mode = #tpu.pipeline_mode<synchronous>, transform_indices = @transform_5, window_bounds = array<i64: 32, 96>}, {pipeline_mode = #tpu.pipeline_mode<synchronous>, transform_indices = @transform_6, window_bounds = array<i64: 1, 96>}, {pipeline_mode = #tpu.pipeline_mode<synchronous>, transform_indices = @transform_7, window_bounds = array<i64: 96, 32>}, {pipeline_mode = #tpu.pipeline_mode<synchronous>, transform_indices = @transform_8, window_bounds = array<i64: 1, 32>}, {transform_indices = @transform_9, window_bounds = array<i64: 2, 8, 32>}]} {
    %c0 = arith.constant 0 : index
    %c0_0 = arith.constant 0 : index
    %0 = vector.load %arg2[%c0, %c0_0] : memref<96x8xbf16, #tpu.memory_space<vmem>>, vector<96x8xbf16>
    %c0_1 = arith.constant 0 : index
    %c0_2 = arith.constant 0 : index
    %1 = vector.load %arg3[%c0_1, %c0_2] : memref<96x1xf32, #tpu.memory_space<vmem>>, vector<96x1xf32>
    %c0_3 = arith.constant 0 : index
    %c0_4 = arith.constant 0 : index
    %2 = vector.load %arg4[%c0_3, %c0_4] : memref<8x96xbf16, #tpu.memory_space<vmem>>, vector<8x96xbf16>
    %c0_5 = arith.constant 0 : index
    %c0_6 = arith.constant 0 : index
    %3 = vector.load %arg5[%c0_5, %c0_6] : memref<8x1xf32, #tpu.memory_space<vmem>>, vector<8x1xf32>
    %c0_i32 = arith.constant 0 : i32
    %c2_i32 = arith.constant 2 : i32
    %4 = arith.addi %c0_i32, %c2_i32 : i32
    %c1_i32 = arith.constant 1 : i32
    scf.for %arg12 = %c0_i32 to %4 step %c1_i32  : i32 {
      %28 = arith.index_cast %arg12 : i32 to index
      %c0_25 = arith.constant 0 : index
      %c0_26 = arith.constant 0 : index
      %29 = vector.load %arg1[%28, %c0_25, %c0_26] : memref<2x8x32xf32, #tpu.memory_space<vmem>>, vector<1x8x32xf32>
      %30 = vector.shape_cast %29 : vector<1x8x32xf32> to vector<8x32xf32>
      %31 = arith.truncf %30 : vector<8x32xf32> to vector<8x32xbf16>
      %cst_27 = arith.constant dense<0.000000e+00> : vector<96x32xf32>
      %32 = tpu.matmul %0, %31, %cst_27 {dimension_numbers = #tpu.dot_dimension_numbers<[1], [0], [0], [1], [0, 0, 1, 1], [], []>} : vector<96x8xbf16>, vector<8x32xbf16>, vector<96x32xf32> -> vector<96x32xf32>
      %33 = vector.broadcast %1 : vector<96x1xf32> to vector<96x32xf32>
      %34 = arith.addf %32, %33 : vector<96x32xf32>
      %cst_28 = arith.constant 2.000000e+00 : f32
      %35 = vector.broadcast %cst_28 : f32 to vector<96x32xf32>
      %36 = arith.mulf %35, %34 : vector<96x32xf32>
      %37 = math.tanh %36 : vector<96x32xf32>
      %38 = arith.truncf %37 : vector<96x32xf32> to vector<96x32xbf16>
      %cst_29 = arith.constant dense<0.000000e+00> : vector<8x32xf32>
      %39 = tpu.matmul %2, %38, %cst_29 {dimension_numbers = #tpu.dot_dimension_numbers<[1], [0], [0], [1], [0, 0, 1, 1], [], []>} : vector<8x96xbf16>, vector<96x32xbf16>, vector<8x32xf32> -> vector<8x32xf32>
      %40 = vector.broadcast %3 : vector<8x1xf32> to vector<8x32xf32>
      %41 = arith.addf %39, %40 : vector<8x32xf32>
      %cst_30 = arith.constant 2.000000e+00 : f32
      %42 = vector.broadcast %cst_30 : f32 to vector<8x32xf32>
      %43 = arith.mulf %42, %41 : vector<8x32xf32>
      %44 = math.tanh %43 : vector<8x32xf32>
      %45 = arith.addf %44, %30 : vector<8x32xf32>
      %cst_31 = arith.constant 2.000000e+00 : f32
      %46 = vector.broadcast %cst_31 : f32 to vector<8x32xf32>
      %47 = arith.mulf %46, %45 : vector<8x32xf32>
      %48 = math.tanh %47 : vector<8x32xf32>
      %49 = arith.index_cast %arg12 : i32 to index
      %c0_32 = arith.constant 0 : index
      %c0_33 = arith.constant 0 : index
      %50 = vector.load %arg11[%49, %c0_32, %c0_33] : memref<2x8x32xf32, #tpu.memory_space<vmem>>, vector<1x8x32xf32>
      %51 = vector.shape_cast %50 : vector<1x8x32xf32> to vector<8x32xf32>
      %52 = vector.shape_cast %48 : vector<8x32xf32> to vector<1x8x32xf32>
      tpu.vector_store %arg11[%49, %c0_32, %c0_33], %52 {strides = array<i32>} : memref<2x8x32xf32, #tpu.memory_space<vmem>>, vector<1x8x32xf32>,
    }
    %c2_i32_7 = arith.constant 2 : i32
    %c0_8 = arith.constant 0 : index
    %c0_9 = arith.constant 0 : index
    %c0_10 = arith.constant 0 : index
    %5 = vector.load %arg11[%c0_8, %c0_9, %c0_10] : memref<2x8x32xf32, #tpu.memory_space<vmem>>, vector<2x8x32xf32>
    %6 = vector.shape_cast %5 : vector<2x8x32xf32> to vector<16x32xf32>
    %7 = arith.truncf %6 : vector<16x32xf32> to vector<16x32xbf16>
    %c0_11 = arith.constant 0 : index
    %c0_12 = arith.constant 0 : index
    %8 = vector.load %arg6[%c0_11, %c0_12] : memref<32x96xbf16, #tpu.memory_space<vmem>>, vector<32x96xbf16>
    %cst = arith.constant dense<0.000000e+00> : vector<16x96xf32>
    %9 = tpu.matmul %7, %8, %cst {dimension_numbers = #tpu.dot_dimension_numbers<[1], [0], [0], [1], [0, 0, 1, 1], [], []>} : vector<16x32xbf16>, vector<32x96xbf16>, vector<16x96xf32> -> vector<16x96xf32>
    %c0_13 = arith.constant 0 : index
    %c0_14 = arith.constant 0 : index
    %10 = vector.load %arg7[%c0_13, %c0_14] : memref<1x96xf32, #tpu.memory_space<vmem>>, vector<1x96xf32>
    %11 = vector.broadcast %10 : vector<1x96xf32> to vector<16x96xf32>
    %12 = arith.addf %9, %11 : vector<16x96xf32>
    %cst_15 = arith.constant 2.000000e+00 : f32
    %13 = vector.broadcast %cst_15 : f32 to vector<16x96xf32>
    %14 = arith.mulf %13, %12 : vector<16x96xf32>
    %15 = math.tanh %14 : vector<16x96xf32>
    %16 = arith.truncf %15 : vector<16x96xf32> to vector<16x96xbf16>
    %c0_16 = arith.constant 0 : index
    %c0_17 = arith.constant 0 : index
    %17 = vector.load %arg8[%c0_16, %c0_17] : memref<96x32xbf16, #tpu.memory_space<vmem>>, vector<96x32xbf16>
    %cst_18 = arith.constant dense<0.000000e+00> : vector<16x32xf32>
    %18 = tpu.matmul %16, %17, %cst_18 {dimension_numbers = #tpu.dot_dimension_numbers<[1], [0], [0], [1], [0, 0, 1, 1], [], []>} : vector<16x96xbf16>, vector<96x32xbf16>, vector<16x32xf32> -> vector<16x32xf32>
    %c0_19 = arith.constant 0 : index
    %c0_20 = arith.constant 0 : index
    %19 = vector.load %arg9[%c0_19, %c0_20] : memref<1x32xf32, #tpu.memory_space<vmem>>, vector<1x32xf32>
    %20 = vector.broadcast %19 : vector<1x32xf32> to vector<16x32xf32>
    %21 = arith.addf %18, %20 : vector<16x32xf32>
    %22 = arith.addf %21, %6 : vector<16x32xf32>
    %cst_21 = arith.constant 2.000000e+00 : f32
    %23 = vector.broadcast %cst_21 : f32 to vector<16x32xf32>
    %24 = arith.mulf %23, %22 : vector<16x32xf32>
    %25 = math.tanh %24 : vector<16x32xf32>
    %26 = vector.shape_cast %25 : vector<16x32xf32> to vector<2x8x32xf32>
    %c0_22 = arith.constant 0 : index
    %c0_23 = arith.constant 0 : index
    %c0_24 = arith.constant 0 : index
    %27 = vector.load %arg10[%c0_22, %c0_23, %c0_24] : memref<2x8x32xf32, #tpu.memory_space<vmem>>, vector<2x8x32xf32>
    tpu.vector_store %arg10[%c0_22, %c0_23, %c0_24], %26 {strides = array<i32>} : memref<2x8x32xf32, #tpu.memory_space<vmem>>, vector<2x8x32xf32>,
    return
  }
  func.func @transform_0(%arg0: i32) -> (i32, i32, i32) {
    %c0_i32 = arith.constant 0 : i32
    %c0_i32_0 = arith.constant 0 : i32
    %c0_i32_1 = arith.constant 0 : i32
    return %arg0, %c0_i32, %c0_i32_0 : i32, i32, i32
  }
  func.func @transform_1(%arg0: i32) -> (i32, i32) {
    %c0_i32 = arith.constant 0 : i32
    %c0_i32_0 = arith.constant 0 : i32
    %c0_i32_1 = arith.constant 0 : i32
    return %c0_i32, %c0_i32_0 : i32, i32
  }
  func.func @transform_2(%arg0: i32) -> (i32, i32) {
    %c0_i32 = arith.constant 0 : i32
    %c0_i32_0 = arith.constant 0 : i32
    %c0_i32_1 = arith.constant 0 : i32
    return %c0_i32, %c0_i32_0 : i32, i32
  }
  func.func @transform_3(%arg0: i32) -> (i32, i32) {
    %c0_i32 = arith.constant 0 : i32
    %c0_i32_0 = arith.constant 0 : i32
    %c0_i32_1 = arith.constant 0 : i32
    return %c0_i32, %c0_i32_0 : i32, i32
  }
  func.func @transform_4(%arg0: i32) -> (i32, i32) {
    %c0_i32 = arith.constant 0 : i32
    %c0_i32_0 = arith.constant 0 : i32
    %c0_i32_1 = arith.constant 0 : i32
    return %c0_i32, %c0_i32_0 : i32, i32
  }
  func.func @transform_5(%arg0: i32) -> (i32, i32) {
    %c0_i32 = arith.constant 0 : i32
    %c0_i32_0 = arith.constant 0 : i32
    %c0_i32_1 = arith.constant 0 : i32
    return %c0_i32, %c0_i32_0 : i32, i32
  }
  func.func @transform_6(%arg0: i32) -> (i32, i32) {
    %c0_i32 = arith.constant 0 : i32
    %c0_i32_0 = arith.constant 0 : i32
    %c0_i32_1 = arith.constant 0 : i32
    return %c0_i32, %c0_i32_0 : i32, i32
  }
  func.func @transform_7(%arg0: i32) -> (i32, i32) {
    %c0_i32 = arith.constant 0 : i32
    %c0_i32_0 = arith.constant 0 : i32
    %c0_i32_1 = arith.constant 0 : i32
    return %c0_i32, %c0_i32_0 : i32, i32
  }
  func.func @transform_8(%arg0: i32) -> (i32, i32) {
    %c0_i32 = arith.constant 0 : i32
    %c0_i32_0 = arith.constant 0 : i32
    %c0_i32_1 = arith.constant 0 : i32
    return %c0_i32, %c0_i32_0 : i32, i32
  }
  func.func @transform_9(%arg0: i32) -> (i32, i32, i32) {
    %c0_i32 = arith.constant 0 : i32
    %c0_i32_0 = arith.constant 0 : i32
    %c0_i32_1 = arith.constant 0 : i32
    return %arg0, %c0_i32, %c0_i32_0 : i32, i32, i32
  }
}

module attributes {stable_mosaic.version = 11 : i64} {
  func.func @_bitmixer_block_kernel(%arg0: i32, %arg1: memref<2x8x32xf32, #tpu.memory_space<vmem>>, %arg2: memref<96x8xbf16, #tpu.memory_space<vmem>>, %arg3: memref<96x1xf32, #tpu.memory_space<vmem>>, %arg4: memref<8x96xbf16, #tpu.memory_space<vmem>>, %arg5: memref<8x1xf32, #tpu.memory_space<vmem>>, %arg6: memref<32x96xbf16, #tpu.memory_space<vmem>>, %arg7: memref<1x96xf32, #tpu.memory_space<vmem>>, %arg8: memref<96x32xbf16, #tpu.memory_space<vmem>>, %arg9: memref<1x32xf32, #tpu.memory_space<vmem>>, %arg10: memref<2x8x32xf32, #tpu.memory_space<vmem>>, %arg11: memref<2x8x32xf32, #tpu.memory_space<vmem>>) attributes {dimension_semantics = [#tpu.dimension_semantics<parallel>], iteration_bounds = array<i64: 2>, scalar_prefetch = 0 : i64, scratch_operands = 1 : i64, tpu.core_type = #tpu.core_type<tc>, window_params = [{transform_indices = @transform_0, window_bounds = array<i64: 2, 8, 32>}, {pipeline_mode = #tpu.pipeline_mode<synchronous>, transform_indices = @transform_1, window_bounds = array<i64: 96, 8>}, {pipeline_mode = #tpu.pipeline_mode<synchronous>, transform_indices = @transform_2, window_bounds = array<i64: 96, 1>}, {pipeline_mode = #tpu.pipeline_mode<synchronous>, transform_indices = @transform_3, window_bounds = array<i64: 8, 96>}, {pipeline_mode = #tpu.pipeline_mode<synchronous>, transform_indices = @transform_4, window_bounds = array<i64: 8, 1>}, {pipeline_mode = #tpu.pipeline_mode<synchronous>, transform_indices = @transform_5, window_bounds = array<i64: 32, 96>}, {pipeline_mode = #tpu.pipeline_mode<synchronous>, transform_indices = @transform_6, window_bounds = array<i64: 1, 96>}, {pipeline_mode = #tpu.pipeline_mode<synchronous>, transform_indices = @transform_7, window_bounds = array<i64: 96, 32>}, {pipeline_mode = #tpu.pipeline_mode<synchronous>, transform_indices = @transform_8, window_bounds = array<i64: 1, 32>}, {transform_indices = @transform_9, window_bounds = array<i64: 2, 8, 32>}]} {
    %c0 = arith.constant 0 : index
    %c0_0 = arith.constant 0 : index
    %0 = vector.load %arg2[%c0, %c0_0] : memref<96x8xbf16, #tpu.memory_space<vmem>>, vector<96x8xbf16>
    %c0_1 = arith.constant 0 : index
    %c0_2 = arith.constant 0 : index
    %1 = vector.load %arg3[%c0_1, %c0_2] : memref<96x1xf32, #tpu.memory_space<vmem>>, vector<96x1xf32>
    %c0_3 = arith.constant 0 : index
    %c0_4 = arith.constant 0 : index
    %2 = vector.load %arg4[%c0_3, %c0_4] : memref<8x96xbf16, #tpu.memory_space<vmem>>, vector<8x96xbf16>
    %c0_5 = arith.constant 0 : index
    %c0_6 = arith.constant 0 : index
    %3 = vector.load %arg5[%c0_5, %c0_6] : memref<8x1xf32, #tpu.memory_space<vmem>>, vector<8x1xf32>
    %c0_i32 = arith.constant 0 : i32
    %c2_i32 = arith.constant 2 : i32
    %4 = arith.addi %c0_i32, %c2_i32 : i32
    %c1_i32 = arith.constant 1 : i32
    scf.for %arg12 = %c0_i32 to %4 step %c1_i32  : i32 {
      %28 = arith.index_cast %arg12 : i32 to index
      %c0_25 = arith.constant 0 : index
      %c0_26 = arith.constant 0 : index
      %29 = vector.load %arg1[%28, %c0_25, %c0_26] : memref<2x8x32xf32, #tpu.memory_space<vmem>>, vector<1x8x32xf32>
      %30 = vector.shape_cast %29 : vector<1x8x32xf32> to vector<8x32xf32>
      %31 = arith.truncf %30 : vector<8x32xf32> to vector<8x32xbf16>
      %cst_27 = arith.constant dense<0.000000e+00> : vector<96x32xf32>
      %32 = tpu.matmul %0, %31, %cst_27 {dimension_numbers = #tpu.dot_dimension_numbers<[1], [0], [0], [1], [0, 0, 1, 1], [], []>} : vector<96x8xbf16>, vector<8x32xbf16>, vector<96x32xf32> -> vector<96x32xf32>
      %33 = vector.broadcast %1 : vector<96x1xf32> to vector<96x32xf32>
      %34 = arith.addf %32, %33 : vector<96x32xf32>
      %cst_28 = arith.constant 2.000000e+00 : f32
      %35 = vector.broadcast %cst_28 : f32 to vector<96x32xf32>
      %36 = arith.mulf %35, %34 : vector<96x32xf32>
      %37 = math.tanh %36 : vector<96x32xf32>
      %38 = arith.truncf %37 : vector<96x32xf32> to vector<96x32xbf16>
      %cst_29 = arith.constant dense<0.000000e+00> : vector<8x32xf32>
      %39 = tpu.matmul %2, %38, %cst_29 {dimension_numbers = #tpu.dot_dimension_numbers<[1], [0], [0], [1], [0, 0, 1, 1], [], []>} : vector<8x96xbf16>, vector<96x32xbf16>, vector<8x32xf32> -> vector<8x32xf32>
      %40 = vector.broadcast %3 : vector<8x1xf32> to vector<8x32xf32>
      %41 = arith.addf %39, %40 : vector<8x32xf32>
      %cst_30 = arith.constant 2.000000e+00 : f32
      %42 = vector.broadcast %cst_30 : f32 to vector<8x32xf32>
      %43 = arith.mulf %42, %41 : vector<8x32xf32>
      %44 = math.tanh %43 : vector<8x32xf32>
      %45 = arith.addf %44, %30 : vector<8x32xf32>
      %cst_31 = arith.constant 2.000000e+00 : f32
      %46 = vector.broadcast %cst_31 : f32 to vector<8x32xf32>
      %47 = arith.mulf %46, %45 : vector<8x32xf32>
      %48 = math.tanh %47 : vector<8x32xf32>
      %49 = arith.index_cast %arg12 : i32 to index
      %c0_32 = arith.constant 0 : index
      %c0_33 = arith.constant 0 : index
      %50 = vector.load %arg11[%49, %c0_32, %c0_33] : memref<2x8x32xf32, #tpu.memory_space<vmem>>, vector<1x8x32xf32>
      %51 = vector.shape_cast %50 : vector<1x8x32xf32> to vector<8x32xf32>
      %52 = vector.shape_cast %48 : vector<8x32xf32> to vector<1x8x32xf32>
      tpu.vector_store %arg11[%49, %c0_32, %c0_33], %52 {strides = array<i32>} : memref<2x8x32xf32, #tpu.memory_space<vmem>>, vector<1x8x32xf32>,
    }
    %c2_i32_7 = arith.constant 2 : i32
    %c0_8 = arith.constant 0 : index
    %c0_9 = arith.constant 0 : index
    %c0_10 = arith.constant 0 : index
    %5 = vector.load %arg11[%c0_8, %c0_9, %c0_10] : memref<2x8x32xf32, #tpu.memory_space<vmem>>, vector<2x8x32xf32>
    %6 = vector.shape_cast %5 : vector<2x8x32xf32> to vector<16x32xf32>
    %7 = arith.truncf %6 : vector<16x32xf32> to vector<16x32xbf16>
    %c0_11 = arith.constant 0 : index
    %c0_12 = arith.constant 0 : index
    %8 = vector.load %arg6[%c0_11, %c0_12] : memref<32x96xbf16, #tpu.memory_space<vmem>>, vector<32x96xbf16>
    %cst = arith.constant dense<0.000000e+00> : vector<16x96xf32>
    %9 = tpu.matmul %7, %8, %cst {dimension_numbers = #tpu.dot_dimension_numbers<[1], [0], [0], [1], [0, 0, 1, 1], [], []>} : vector<16x32xbf16>, vector<32x96xbf16>, vector<16x96xf32> -> vector<16x96xf32>
    %c0_13 = arith.constant 0 : index
    %c0_14 = arith.constant 0 : index
    %10 = vector.load %arg7[%c0_13, %c0_14] : memref<1x96xf32, #tpu.memory_space<vmem>>, vector<1x96xf32>
    %11 = vector.broadcast %10 : vector<1x96xf32> to vector<16x96xf32>
    %12 = arith.addf %9, %11 : vector<16x96xf32>
    %cst_15 = arith.constant 2.000000e+00 : f32
    %13 = vector.broadcast %cst_15 : f32 to vector<16x96xf32>
    %14 = arith.mulf %13, %12 : vector<16x96xf32>
    %15 = math.tanh %14 : vector<16x96xf32>
    %16 = arith.truncf %15 : vector<16x96xf32> to vector<16x96xbf16>
    %c0_16 = arith.constant 0 : index
    %c0_17 = arith.constant 0 : index
    %17 = vector.load %arg8[%c0_16, %c0_17] : memref<96x32xbf16, #tpu.memory_space<vmem>>, vector<96x32xbf16>
    %cst_18 = arith.constant dense<0.000000e+00> : vector<16x32xf32>
    %18 = tpu.matmul %16, %17, %cst_18 {dimension_numbers = #tpu.dot_dimension_numbers<[1], [0], [0], [1], [0, 0, 1, 1], [], []>} : vector<16x96xbf16>, vector<96x32xbf16>, vector<16x32xf32> -> vector<16x32xf32>
    %c0_19 = arith.constant 0 : index
    %c0_20 = arith.constant 0 : index
    %19 = vector.load %arg9[%c0_19, %c0_20] : memref<1x32xf32, #tpu.memory_space<vmem>>, vector<1x32xf32>
    %20 = vector.broadcast %19 : vector<1x32xf32> to vector<16x32xf32>
    %21 = arith.addf %18, %20 : vector<16x32xf32>
    %22 = arith.addf %21, %6 : vector<16x32xf32>
    %cst_21 = arith.constant 2.000000e+00 : f32
    %23 = vector.broadcast %cst_21 : f32 to vector<16x32xf32>
    %24 = arith.mulf %23, %22 : vector<16x32xf32>
    %25 = math.tanh %24 : vector<16x32xf32>
    %26 = vector.shape_cast %25 : vector<16x32xf32> to vector<2x8x32xf32>
    %c0_22 = arith.constant 0 : index
    %c0_23 = arith.constant 0 : index
    %c0_24 = arith.constant 0 : index
    %27 = vector.load %arg10[%c0_22, %c0_23, %c0_24] : memref<2x8x32xf32, #tpu.memory_space<vmem>>, vector<2x8x32xf32>
    tpu.vector_store %arg10[%c0_22, %c0_23, %c0_24], %26 {strides = array<i32>} : memref<2x8x32xf32, #tpu.memory_space<vmem>>, vector<2x8x32xf32>,
    return
  }
  func.func @transform_0(%arg0: i32) -> (i32, i32, i32) {
    %c0_i32 = arith.constant 0 : i32
    %c0_i32_0 = arith.constant 0 : i32
    %c0_i32_1 = arith.constant 0 : i32
    return %arg0, %c0_i32, %c0_i32_0 : i32, i32, i32
  }
  func.func @transform_1(%arg0: i32) -> (i32, i32) {
    %c0_i32 = arith.constant 0 : i32
    %c0_i32_0 = arith.constant 0 : i32
    %c0_i32_1 = arith.constant 0 : i32
    return %c0_i32, %c0_i32_0 : i32, i32
  }
  func.func @transform_2(%arg0: i32) -> (i32, i32) {
    %c0_i32 = arith.constant 0 : i32
    %c0_i32_0 = arith.constant 0 : i32
    %c0_i32_1 = arith.constant 0 : i32
    return %c0_i32, %c0_i32_0 : i32, i32
  }
  func.func @transform_3(%arg0: i32) -> (i32, i32) {
    %c0_i32 = arith.constant 0 : i32
    %c0_i32_0 = arith.constant 0 : i32
    %c0_i32_1 = arith.constant 0 : i32
    return %c0_i32, %c0_i32_0 : i32, i32
  }
  func.func @transform_4(%arg0: i32) -> (i32, i32) {
    %c0_i32 = arith.constant 0 : i32
    %c0_i32_0 = arith.constant 0 : i32
    %c0_i32_1 = arith.constant 0 : i32
    return %c0_i32, %c0_i32_0 : i32, i32
  }
  func.func @transform_5(%arg0: i32) -> (i32, i32) {
    %c0_i32 = arith.constant 0 : i32
    %c0_i32_0 = arith.constant 0 : i32
    %c0_i32_1 = arith.constant 0 : i32
    return %c0_i32, %c0_i32_0 : i32, i32
  }
  func.func @transform_6(%arg0: i32) -> (i32, i32) {
    %c0_i32 = arith.constant 0 : i32
    %c0_i32_0 = arith.constant 0 : i32
    %c0_i32_1 = arith.constant 0 : i32
    return %c0_i32, %c0_i32_0 : i32, i32
  }
  func.func @transform_7(%arg0: i32) -> (i32, i32) {
    %c0_i32 = arith.constant 0 : i32
    %c0_i32_0 = arith.constant 0 : i32
    %c0_i32_1 = arith.constant 0 : i32
    return %c0_i32, %c0_i32_0 : i32, i32
  }
  func.func @transform_8(%arg0: i32) -> (i32, i32) {
    %c0_i32 = arith.constant 0 : i32
    %c0_i32_0 = arith.constant 0 : i32
    %c0_i32_1 = arith.constant 0 : i32
    return %c0_i32, %c0_i32_0 : i32, i32
  }
  func.func @transform_9(%arg0: i32) -> (i32, i32, i32) {
    %c0_i32 = arith.constant 0 : i32
    %c0_i32_0 = arith.constant 0 : i32
    %c0_i32_1 = arith.constant 0 : i32
    return %arg0, %c0_i32, %c0_i32_0 : i32, i32, i32
  }
}

module attributes {stable_mosaic.version = 11 : i64} {
  func.func @_bitmixer_block_kernel(%arg0: i32, %arg1: memref<2x8x32xf32, #tpu.memory_space<vmem>>, %arg2: memref<96x8xbf16, #tpu.memory_space<vmem>>, %arg3: memref<96x1xf32, #tpu.memory_space<vmem>>, %arg4: memref<8x96xbf16, #tpu.memory_space<vmem>>, %arg5: memref<8x1xf32, #tpu.memory_space<vmem>>, %arg6: memref<32x96xbf16, #tpu.memory_space<vmem>>, %arg7: memref<1x96xf32, #tpu.memory_space<vmem>>, %arg8: memref<96x32xbf16, #tpu.memory_space<vmem>>, %arg9: memref<1x32xf32, #tpu.memory_space<vmem>>, %arg10: memref<2x8x32xf32, #tpu.memory_space<vmem>>, %arg11: memref<2x8x32xf32, #tpu.memory_space<vmem>>) attributes {dimension_semantics = [#tpu.dimension_semantics<parallel>], iteration_bounds = array<i64: 2>, scalar_prefetch = 0 : i64, scratch_operands = 1 : i64, tpu.core_type = #tpu.core_type<tc>, window_params = [{transform_indices = @transform_0, window_bounds = array<i64: 2, 8, 32>}, {pipeline_mode = #tpu.pipeline_mode<synchronous>, transform_indices = @transform_1, window_bounds = array<i64: 96, 8>}, {pipeline_mode = #tpu.pipeline_mode<synchronous>, transform_indices = @transform_2, window_bounds = array<i64: 96, 1>}, {pipeline_mode = #tpu.pipeline_mode<synchronous>, transform_indices = @transform_3, window_bounds = array<i64: 8, 96>}, {pipeline_mode = #tpu.pipeline_mode<synchronous>, transform_indices = @transform_4, window_bounds = array<i64: 8, 1>}, {pipeline_mode = #tpu.pipeline_mode<synchronous>, transform_indices = @transform_5, window_bounds = array<i64: 32, 96>}, {pipeline_mode = #tpu.pipeline_mode<synchronous>, transform_indices = @transform_6, window_bounds = array<i64: 1, 96>}, {pipeline_mode = #tpu.pipeline_mode<synchronous>, transform_indices = @transform_7, window_bounds = array<i64: 96, 32>}, {pipeline_mode = #tpu.pipeline_mode<synchronous>, transform_indices = @transform_8, window_bounds = array<i64: 1, 32>}, {transform_indices = @transform_9, window_bounds = array<i64: 2, 8, 32>}]} {
    %c0 = arith.constant 0 : index
    %c0_0 = arith.constant 0 : index
    %0 = vector.load %arg2[%c0, %c0_0] : memref<96x8xbf16, #tpu.memory_space<vmem>>, vector<96x8xbf16>
    %c0_1 = arith.constant 0 : index
    %c0_2 = arith.constant 0 : index
    %1 = vector.load %arg3[%c0_1, %c0_2] : memref<96x1xf32, #tpu.memory_space<vmem>>, vector<96x1xf32>
    %c0_3 = arith.constant 0 : index
    %c0_4 = arith.constant 0 : index
    %2 = vector.load %arg4[%c0_3, %c0_4] : memref<8x96xbf16, #tpu.memory_space<vmem>>, vector<8x96xbf16>
    %c0_5 = arith.constant 0 : index
    %c0_6 = arith.constant 0 : index
    %3 = vector.load %arg5[%c0_5, %c0_6] : memref<8x1xf32, #tpu.memory_space<vmem>>, vector<8x1xf32>
    %c0_i32 = arith.constant 0 : i32
    %c2_i32 = arith.constant 2 : i32
    %4 = arith.addi %c0_i32, %c2_i32 : i32
    %c1_i32 = arith.constant 1 : i32
    scf.for %arg12 = %c0_i32 to %4 step %c1_i32  : i32 {
      %28 = arith.index_cast %arg12 : i32 to index
      %c0_25 = arith.constant 0 : index
      %c0_26 = arith.constant 0 : index
      %29 = vector.load %arg1[%28, %c0_25, %c0_26] : memref<2x8x32xf32, #tpu.memory_space<vmem>>, vector<1x8x32xf32>
      %30 = vector.shape_cast %29 : vector<1x8x32xf32> to vector<8x32xf32>
      %31 = arith.truncf %30 : vector<8x32xf32> to vector<8x32xbf16>
      %cst_27 = arith.constant dense<0.000000e+00> : vector<96x32xf32>
      %32 = tpu.matmul %0, %31, %cst_27 {dimension_numbers = #tpu.dot_dimension_numbers<[1], [0], [0], [1], [0, 0, 1, 1], [], []>} : vector<96x8xbf16>, vector<8x32xbf16>, vector<96x32xf32> -> vector<96x32xf32>
      %33 = vector.broadcast %1 : vector<96x1xf32> to vector<96x32xf32>
      %34 = arith.addf %32, %33 : vector<96x32xf32>
      %cst_28 = arith.constant 2.000000e+00 : f32
      %35 = vector.broadcast %cst_28 : f32 to vector<96x32xf32>
      %36 = arith.mulf %35, %34 : vector<96x32xf32>
      %37 = math.tanh %36 : vector<96x32xf32>
      %38 = arith.truncf %37 : vector<96x32xf32> to vector<96x32xbf16>
      %cst_29 = arith.constant dense<0.000000e+00> : vector<8x32xf32>
      %39 = tpu.matmul %2, %38, %cst_29 {dimension_numbers = #tpu.dot_dimension_numbers<[1], [0], [0], [1], [0, 0, 1, 1], [], []>} : vector<8x96xbf16>, vector<96x32xbf16>, vector<8x32xf32> -> vector<8x32xf32>
      %40 = vector.broadcast %3 : vector<8x1xf32> to vector<8x32xf32>
      %41 = arith.addf %39, %40 : vector<8x32xf32>
      %cst_30 = arith.constant 2.000000e+00 : f32
      %42 = vector.broadcast %cst_30 : f32 to vector<8x32xf32>
      %43 = arith.mulf %42, %41 : vector<8x32xf32>
      %44 = math.tanh %43 : vector<8x32xf32>
      %45 = arith.addf %44, %30 : vector<8x32xf32>
      %cst_31 = arith.constant 2.000000e+00 : f32
      %46 = vector.broadcast %cst_31 : f32 to vector<8x32xf32>
      %47 = arith.mulf %46, %45 : vector<8x32xf32>
      %48 = math.tanh %47 : vector<8x32xf32>
      %49 = arith.index_cast %arg12 : i32 to index
      %c0_32 = arith.constant 0 : index
      %c0_33 = arith.constant 0 : index
      %50 = vector.load %arg11[%49, %c0_32, %c0_33] : memref<2x8x32xf32, #tpu.memory_space<vmem>>, vector<1x8x32xf32>
      %51 = vector.shape_cast %50 : vector<1x8x32xf32> to vector<8x32xf32>
      %52 = vector.shape_cast %48 : vector<8x32xf32> to vector<1x8x32xf32>
      tpu.vector_store %arg11[%49, %c0_32, %c0_33], %52 {strides = array<i32>} : memref<2x8x32xf32, #tpu.memory_space<vmem>>, vector<1x8x32xf32>,
    }
    %c2_i32_7 = arith.constant 2 : i32
    %c0_8 = arith.constant 0 : index
    %c0_9 = arith.constant 0 : index
    %c0_10 = arith.constant 0 : index
    %5 = vector.load %arg11[%c0_8, %c0_9, %c0_10] : memref<2x8x32xf32, #tpu.memory_space<vmem>>, vector<2x8x32xf32>
    %6 = vector.shape_cast %5 : vector<2x8x32xf32> to vector<16x32xf32>
    %7 = arith.truncf %6 : vector<16x32xf32> to vector<16x32xbf16>
    %c0_11 = arith.constant 0 : index
    %c0_12 = arith.constant 0 : index
    %8 = vector.load %arg6[%c0_11, %c0_12] : memref<32x96xbf16, #tpu.memory_space<vmem>>, vector<32x96xbf16>
    %cst = arith.constant dense<0.000000e+00> : vector<16x96xf32>
    %9 = tpu.matmul %7, %8, %cst {dimension_numbers = #tpu.dot_dimension_numbers<[1], [0], [0], [1], [0, 0, 1, 1], [], []>} : vector<16x32xbf16>, vector<32x96xbf16>, vector<16x96xf32> -> vector<16x96xf32>
    %c0_13 = arith.constant 0 : index
    %c0_14 = arith.constant 0 : index
    %10 = vector.load %arg7[%c0_13, %c0_14] : memref<1x96xf32, #tpu.memory_space<vmem>>, vector<1x96xf32>
    %11 = vector.broadcast %10 : vector<1x96xf32> to vector<16x96xf32>
    %12 = arith.addf %9, %11 : vector<16x96xf32>
    %cst_15 = arith.constant 2.000000e+00 : f32
    %13 = vector.broadcast %cst_15 : f32 to vector<16x96xf32>
    %14 = arith.mulf %13, %12 : vector<16x96xf32>
    %15 = math.tanh %14 : vector<16x96xf32>
    %16 = arith.truncf %15 : vector<16x96xf32> to vector<16x96xbf16>
    %c0_16 = arith.constant 0 : index
    %c0_17 = arith.constant 0 : index
    %17 = vector.load %arg8[%c0_16, %c0_17] : memref<96x32xbf16, #tpu.memory_space<vmem>>, vector<96x32xbf16>
    %cst_18 = arith.constant dense<0.000000e+00> : vector<16x32xf32>
    %18 = tpu.matmul %16, %17, %cst_18 {dimension_numbers = #tpu.dot_dimension_numbers<[1], [0], [0], [1], [0, 0, 1, 1], [], []>} : vector<16x96xbf16>, vector<96x32xbf16>, vector<16x32xf32> -> vector<16x32xf32>
    %c0_19 = arith.constant 0 : index
    %c0_20 = arith.constant 0 : index
    %19 = vector.load %arg9[%c0_19, %c0_20] : memref<1x32xf32, #tpu.memory_space<vmem>>, vector<1x32xf32>
    %20 = vector.broadcast %19 : vector<1x32xf32> to vector<16x32xf32>
    %21 = arith.addf %18, %20 : vector<16x32xf32>
    %22 = arith.addf %21, %6 : vector<16x32xf32>
    %cst_21 = arith.constant 2.000000e+00 : f32
    %23 = vector.broadcast %cst_21 : f32 to vector<16x32xf32>
    %24 = arith.mulf %23, %22 : vector<16x32xf32>
    %25 = math.tanh %24 : vector<16x32xf32>
    %26 = vector.shape_cast %25 : vector<16x32xf32> to vector<2x8x32xf32>
    %c0_22 = arith.constant 0 : index
    %c0_23 = arith.constant 0 : index
    %c0_24 = arith.constant 0 : index
    %27 = vector.load %arg10[%c0_22, %c0_23, %c0_24] : memref<2x8x32xf32, #tpu.memory_space<vmem>>, vector<2x8x32xf32>
    tpu.vector_store %arg10[%c0_22, %c0_23, %c0_24], %26 {strides = array<i32>} : memref<2x8x32xf32, #tpu.memory_space<vmem>>, vector<2x8x32xf32>,
    return
  }
  func.func @transform_0(%arg0: i32) -> (i32, i32, i32) {
    %c0_i32 = arith.constant 0 : i32
    %c0_i32_0 = arith.constant 0 : i32
    %c0_i32_1 = arith.constant 0 : i32
    return %arg0, %c0_i32, %c0_i32_0 : i32, i32, i32
  }
  func.func @transform_1(%arg0: i32) -> (i32, i32) {
    %c0_i32 = arith.constant 0 : i32
    %c0_i32_0 = arith.constant 0 : i32
    %c0_i32_1 = arith.constant 0 : i32
    return %c0_i32, %c0_i32_0 : i32, i32
  }
  func.func @transform_2(%arg0: i32) -> (i32, i32) {
    %c0_i32 = arith.constant 0 : i32
    %c0_i32_0 = arith.constant 0 : i32
    %c0_i32_1 = arith.constant 0 : i32
    return %c0_i32, %c0_i32_0 : i32, i32
  }
  func.func @transform_3(%arg0: i32) -> (i32, i32) {
    %c0_i32 = arith.constant 0 : i32
    %c0_i32_0 = arith.constant 0 : i32
    %c0_i32_1 = arith.constant 0 : i32
    return %c0_i32, %c0_i32_0 : i32, i32
  }
  func.func @transform_4(%arg0: i32) -> (i32, i32) {
    %c0_i32 = arith.constant 0 : i32
    %c0_i32_0 = arith.constant 0 : i32
    %c0_i32_1 = arith.constant 0 : i32
    return %c0_i32, %c0_i32_0 : i32, i32
  }
  func.func @transform_5(%arg0: i32) -> (i32, i32) {
    %c0_i32 = arith.constant 0 : i32
    %c0_i32_0 = arith.constant 0 : i32
    %c0_i32_1 = arith.constant 0 : i32
    return %c0_i32, %c0_i32_0 : i32, i32
  }
  func.func @transform_6(%arg0: i32) -> (i32, i32) {
    %c0_i32 = arith.constant 0 : i32
    %c0_i32_0 = arith.constant 0 : i32
    %c0_i32_1 = arith.constant 0 : i32
    return %c0_i32, %c0_i32_0 : i32, i32
  }
  func.func @transform_7(%arg0: i32) -> (i32, i32) {
    %c0_i32 = arith.constant 0 : i32
    %c0_i32_0 = arith.constant 0 : i32
    %c0_i32_1 = arith.constant 0 : i32
    return %c0_i32, %c0_i32_0 : i32, i32
  }
  func.func @transform_8(%arg0: i32) -> (i32, i32) {
    %c0_i32 = arith.constant 0 : i32
    %c0_i32_0 = arith.constant 0 : i32
    %c0_i32_1 = arith.constant 0 : i32
    return %c0_i32, %c0_i32_0 : i32, i32
  }
  func.func @transform_9(%arg0: i32) -> (i32, i32, i32) {
    %c0_i32 = arith.constant 0 : i32
    %c0_i32_0 = arith.constant 0 : i32
    %c0_i32_1 = arith.constant 0 : i32
    return %arg0, %c0_i32, %c0_i32_0 : i32, i32, i32
  }
}

</mosaic_0001>

<bundles_post_ra>
// kernel: bitmixer_forward.3
= control target key start
LH: loop header
LB: loop body
LE: loop exit
PB: predicated region body
PF: predicated region fallthrough
CT: control target
= control target key end

     0   :  { %14 = vsyncpa [#allocation4], 0  ;;  %s1603_s0 = inlined_call_operand.vmem [shape: f32[4,8,32], index: 0, kind: input, shape index: {}]   ;;  %s1604_s1 = inlined_call_operand.vmem [shape: bf16[96,8], index: 1, kind: input, shape index: {}]   ;;  %s1605_s2 = inlined_call_operand.vmem [shape: f32[96,1], index: 2, kind: input, shape index: {}]   ;;  %s1606_s3 = inlined_call_operand.vmem [shape: bf16[8,96], index: 3, kind: input, shape index: {}]   ;;  %s1607_s4 = inlined_call_operand.vmem [shape: f32[8,1], index: 4, kind: input, shape index: {}]   ;;  %s1608_s5 = inlined_call_operand.vmem [shape: bf16[32,96], index: 5, kind: input, shape index: {}]   ;;  %s1609_s6 = inlined_call_operand.vmem [shape: f32[1,96], index: 6, kind: input, shape index: {}]   ;;  %s1610_s7 = inlined_call_operand.vmem [shape: bf16[96,32], index: 7, kind: input, shape index: {}]   ;;  %s1611_s8 = inlined_call_operand.vmem [shape: f32[1,32], index: 8, kind: input, shape index: {}]   ;;  %s1612_s9 = inlined_call_operand.hbm [shape: f32[4,8,32], index: 9, kind: output, shape index: {}]  }
   0x1   :  { %16 = vsyncpa [#allocation4 + $0x1], 0  ;;  %s1267_s30 = smov 0   ;;  %s1269_s10 = smov 0  }
   0x2   :  { %s1271_s11 = smov 0   ;;  %s1273_s12 = smov 0  }
   0x3 LB: > { %s1288_s13 = sadd.s32 4294967295, %s1203_s12   ;;  %s921_s14 = sadd.s32 4294967294, %s1203_s12   ;;  %s1203_s12 = sphi %s1273_s12, %s1622_s12   ;;  %s1199_s11 = sphi %s1271_s11, %s1621_s11   ;;  %s1195_s10 = sphi %s1269_s10, %s1620_s10   ;;  %s1191_s30 = sphi %s1267_s30, %s1619_s30  }
   0x4   : > { %s1292_s15 = sadd.s32 1, %s1203_s12   ;;  %s223_s16 = sadd.s32 1, %s1199_s11 }
   0x5   : > { %s220_s17 = ssub.s32 %s1203_s12, %s1292_s15  ;;  %p233_p0 = scmp.ne.s32.totalorder %s1199_s11, %s1195_s10 }
   0x6   : > { %p221_p1 = scmp.eq.s32.totalorder %s220_s17, 0  ;;  %p234_p2 = scmp.eq.s32.totalorder %s1288_s13, 1 }
   0x7   : > { %p239_p3 = scmp.ne.s32.totalorder %s1195_s10, %s1191_s30  ;;  %p240_p4 = scmp.eq.s32.totalorder %s921_s14, 1 }
   0x8   : > { %s1303_s18 = scalar_select %p221_p1, %s1199_s11, %s223_s16  }
   0x9   : > { %p1305_p5 = por %p234_p2, %p233_p0  ;;  %p1309_p6 = por %p240_p4, %p239_p3 }
   0xa   : > { %1614 = sst [smem:[#allocation6_spill]] %s1303_s18  ;;  %p924_p7 = scmp.ge.s32.totalorder %s1203_s12, 1 }
   0xb   : > { %p291_p8 = scmp.lt.s32.totalorder %s1203_s12, 3 }
   0xd   : > { %p292_p9 = pnand %p924_p7, %p291_p8 }
   0xe   : > { %s1613_s21 = sand.u32 (!%p292_p9), 1, %s1195_s10   ;;  %s926_s22 = sshll.u32 (!%p292_p9), %s1288_s13, 1 }
   0xf   : > { %295 = sbr.rel (%p292_p9) target bundleno = 982 (0x3d6), region = 56  ;;  %s925_s27 = sshll.u32 (!%p292_p9), %s1613_s21, 4 }
  0x10   : > { %p328_p10 = scmp.lt.s32.totalorder (!%p292_p9), %s926_s22, 3  ;;  %s1454_s26 = scalar_lea.vmem (!%p292_p9), [#allocation3], %s925_s27 }
  0x11   : > { %s1456_s18 = smov (!%p292_p9), 0  }
  0x14   : > { %v1320_v0 = vld [vmem:[%s1604_s1] sm:$0xf]  ;;  %v1325_v1 = vld [vmem:[%s1604_s1 + $0x4] sm:$0xf]  ;;  %v1332_v2 = vld [vmem:[%s1604_s1 + $0x8] sm:$0xf] }
  0x15   : > { %v1337_v3 = vld [vmem:[%s1604_s1 + $0xc] sm:$0xf]  ;;  %v1342_v4 = vld [vmem:[%s1604_s1 + $0x10] sm:$0xf]  ;;  %v1347_v5 = vld [vmem:[%s1604_s1 + $0x14] sm:$0xf] }
  0x16   : > { %v1352_v6 = vld [vmem:[%s1605_s2] sm:$0xff]  ;;  %s1624_s22 = smov (!%p328_p10, %s926_s22), 3  ;;  %v1357_v7 = vld [vmem:[%s1604_s1 + $0x18] sm:$0xf]  ;;  %v1362_v8 = vld [vmem:[%s1604_s1 + $0x1c] sm:$0xf] }
  0x17   : > { %v1367_v9 = vld [vmem:[%s1605_s2 + $0x8] sm:$0xff]  ;;  %v1372_v10 = vld [vmem:[%s1604_s1 + $0x20] sm:$0xf]  ;;  %v1377_v11 = vld [vmem:[%s1604_s1 + $0x24] sm:$0xf]  ;;  %s927_s14 = sshll.u32 %s1624_s22, 3 }
  0x18   : > { %v1382_v12 = vld [vmem:[%s1604_s1 + $0x28] sm:$0xf]  ;;  %v1387_v13 = vld [vmem:[%s1604_s1 + $0x2c] sm:$0xf]  ;;  %v1392_v14 = vld [vmem:[%s1605_s2 + $0x10] sm:$0xff]  ;;  %s1402_s29 = scalar_lea.vmem %s1603_s0, %s927_s14 }
  0x19   : > { %v1397_v15 = vld [vmem:[%s1605_s2 + $0x18] sm:$0xff]  ;;  %v1407_v16 = vld [vmem:[%s1605_s2 + $0x20] sm:$0xff]  ;;  %v1412_v17 = vld [vmem:[%s1605_s2 + $0x28] sm:$0xff] }
  0x1a   : > { %v1417_v18 = vld [vmem:[%s1605_s2 + $0x30] sm:$0xff]  ;;  %v1422_v19 = vld [vmem:[%s1605_s2 + $0x38] sm:$0xff]  ;;  %v1427_v20 = vld [vmem:[%s1605_s2 + $0x40] sm:$0xff] }
  0x1b   : > { %v1432_v21 = vld [vmem:[%s1605_s2 + $0x48] sm:$0xff]  ;;  %v1437_v22 = vld [vmem:[%s1605_s2 + $0x50] sm:$0xff]  ;;  %v1442_v23 = vld [vmem:[%s1605_s2 + $0x58] sm:$0xff] }
  0x1c   : > { %v1447_v24 = vld [vmem:[%s1606_s3] sm:$0xf] }
  0x1d   : > { %v1452_v25 = vld [vmem:[%s1607_s4] sm:$0xff] }
  0x1e LB: >> { %v929_v26 = vcombine.low %v1320_v0, %v1325_v1  ;;  %vm461_vm0 = vcmask 64512   ;;  %s928_s28 = sshll.u32 %s1207_s18, 3  ;;  %v1209_v27 = vmov 0   ;;  %vm480_vm1 = vcmask 1043456   ;;  %s366_s18 = sadd.s32 1, %s1207_s18   ;;  %s1207_s18 = sphi %s1456_s18, %s366_s18  }
  0x1f   : >> { %s368_s27 = scalar_lea.vmem %s1402_s29, %s928_s28  ;;  %1093 = vset.pattern.permute.xlu0 %v1209_v27  ;;  %1094 = vset.pattern.permute.xlu1 %v1209_v27  ;;  %v930_v31 = vcombine.low %v1332_v2, %v1337_v3  ;;  %v931_v32 = vcombine.low %v1342_v4, %v1347_v5  ;;  %v932_v33 = vcombine.low %v1357_v7, %v1362_v8  ;;  %v1210_v36 = vmov 0.0   ;;  %s649_s22 = scalar_lea.vmem [#allocation2], %s928_s28 }
  0x20   : >> { %986 = vmatprep.mubr.msk.bf16.mxu0 %vm461_vm0, %v929_v26  ;;  %v1468_v28 = vld [vmem:[%s368_s27] sm:$0xff]  ;;  %423 = vperm.xlu0 %1093, %v1437_v22   ;;  %v933_v34 = vcombine.low %v1372_v10, %v1377_v11  ;;  %v934_v35 = vcombine.low %v1382_v12, %v1387_v13  ;;  %vm1211_vm2 = vmmov 0   ;;  %vm600_vm3 = vcmask 785408   ;;  %p363_p11 = scmp.ge.s32.totalorder %s366_s18, 2  }
  0x21   : >> { %413 = vperm.xlu1 %1094, %v1427_v20   ;;  %v370_v29 = vpack.c.bf16 %v1468_v28, %v1468_v28  ;;  %998 = vmatprep.subr.bf16.mxu1 %v1210_v36  ;;  %vm650_vm4 = vcmask 261120   ;;  %vm1213_vm5 = vmmov (%p363_p11), 0   ;;  %v1125_v0 = vld [vmem:[%s1610_s7 + $0x28] sm:$0xff] (%p363_p11)   ;;  %v1126_v1 = vld [vmem:[%s1610_s7 + $0x20] sm:$0xff] (%p363_p11)   ;;  %v1127_v2 = vld [vmem:[%s1610_s7 + $0x18] sm:$0xff] (%p363_p11)   ;;  %s959_s18 = sshll.u32 (%p363_p11), %s1288_s13, 8 }
  0x22   : >> { %1010 = vmatprep.mubr.msk.bf16.mxu1 %vm1211_vm2, %v1210_v36  ;;  %v1128_v3 = vld [vmem:[%s1610_s7 + $0x10] sm:$0xff] (%p363_p11)   ;;  %v1129_v4 = vld [vmem:[%s1610_s7 + $0x8] sm:$0xff] (%p363_p11)   ;;  %v1130_v5 = vld [vmem:[%s1610_s7] sm:$0xff] (%p363_p11)   ;;  %s850_s28 = sshll.u32 (%p363_p11), %s1454_s26, 4  ;;  %s1555_s16 = scalar_lea.hbm (%p363_p11), %s1612_s9, %s959_s18  ;;  %s1557_s28 = int_to_ptr.vmem [resolvable:$true] %s850_s28 }
  0x23   : >> { %1038 = vmatprep.subr.msk.bf16.mxu0 %vm480_vm1, %v370_v29  ;;  %v482_v30 = vsel %vm480_vm1, %v370_v29, 0  ;;  %s1617_s17 = sand.u32 (%p363_p11), 1, %s1195_s10   ;;  %s1139_s13 = scalar_lea.vmem (%p363_p11), %s1557_s28, 256 }
  0x24   : >> { %985 = vmatpush3.bf16.msra.mxu0 %v482_v30  ;;  %428 = vperm.xlu0 %1093, %v1442_v23   ;;  %s1563_s23 = scalar_lea.sflag (%p363_p11), [#allocation4], %s1617_s17  ;;  %p1140_p12 = scmp.ne.s32.totalorder (%p363_p11), %s1557_s28, %s1139_s13 }
  0x25   : >> { %418 = vperm.xlu1 %1094, %v1432_v21   ;;  %s1214_s24 = smov (%p363_p11), [#allocation3]  }
  0x26   : > { %p1141_p13 = pnand (%p363_p11), %p1140_p12, %p1305_p5  ;;  %s1143_s29 = sshll.u32 (%p363_p11), %s1214_s24, 4  ;;  %s1144_s29 = int_to_ptr.vmem [resolvable:$false] %s1143_s29 }
  0x27   : >> { %987 = vmatmul.mubr.msk.bf16.vlgmr.msra.gmra.mxu0 %vm461_vm0, %v930_v31  ;;  %s1145_s21 = scalar_lea.vmem (%p363_p11), %s1144_s29, 512  ;;  %p1146_p1 = scmp.lt.s32.totalorder (%p363_p11), %s1557_s28, %s1144_s29 }
  0x28   : >> { %990 = vmatprep.mubr.msk.bf16.mxu0 %vm461_vm0, %v931_v32  ;;  %403 = vperm.xlu0 %1093, %v1417_v18   ;;  %v946_v18 = vld [vmem:[%s1611_s8] ss:$0 sm:$0xff] (%p363_p11)  ;;  %p1142_p0 = pneg (%p363_p11), %p1141_p13  ;;  %p1147_p2 = scmp.lt.s32.totalorder (%p363_p11), %s1145_s21, %s1139_s13 }
  0x29   : >> { %408 = vperm.xlu1 %1094, %v1422_v19  }
  0x2a   : > { %p1148_p3 = por (%p363_p11), %p1147_p2, %p1146_p1 }
  0x2c   : >> { %393 = vperm.xlu0 %1093, %v1407_v16   ;;  %p1149_p4 = pnand (%p363_p11), %p1148_p3, %p1142_p0 }
  0x2d   : >> { %398 = vperm.xlu1 %1094, %v1412_v17  }
  0x2f   : >> { %991 = vmatmul.mubr.msk.bf16.gmra.mxu0 %vm461_vm0, %v932_v33 }
  0x30   : >> { %994 = vmatprep.mubr.msk.bf16.mxu0 %vm461_vm0, %v933_v34  ;;  %383 = vperm.xlu0 %1093, %v1392_v14  }
  0x31   : >> { %388 = vperm.xlu1 %1094, %v1397_v15  }
  0x34   : >> { %373 = vperm.xlu0 %1093, %v1352_v6   ;;  %v942_v6 = vld [vmem:[%s1609_s6] ss:$0 sm:$0xff] (%p363_p11) }
  0x35   : >> { %378 = vperm.xlu1 %1094, %v1367_v9  }
  0x37   : >> { %995 = vmatmul.mubr.msk.bf16.gmra.mxu0 %vm461_vm0, %v934_v35 }
  0x38   : >> { %597 = vperm.xlu0 %1093, %v1452_v25  }
  0x9b   : >> { %v424_v40 = vpop.permute.xlu0 %423 }
  0x9c   : >> { %v414_v38 = vpop.permute.xlu1 %413 }
  0x9f   : >> { %v429_v45 = vpop.permute.xlu0 %428 }
  0xa0   : >> { %v419_v43 = vpop.permute.xlu1 %418 }
  0xa3   : >> { %v404_v50 = vpop.permute.xlu0 %403 }
  0xa4   : >> { %v409_v48 = vpop.permute.xlu1 %408 }
  0xa7   : >> { %v394_v59 = vpop.permute.xlu0 %393 }
  0xa8   : >> { %v399_v54 = vpop.permute.xlu1 %398 }
  0xab   : >> { %v384_v33 = vpop.permute.xlu0 %383 }
  0xac   : >> { %v389_v30 = vpop.permute.xlu1 %388 }
  0xe7   : >> { %v988_v37 = vpop.f32.mrf.mxu0 }
  0xe9   : >> { %v518_v39 = vpop.f32.mrf.mxu0 }
  0xeb   : >> { %v989_v41 = vpop.f32.mrf.mxu0 }
  0xed   : >> { %v521_v42 = vpop.f32.mrf.mxu0 }
  0xef   : >> { %v992_v44 = vpop.f32.mrf.mxu0 }
  0xf0   : >> { %v543_v26 = vadd.f32 %v992_v44, %v404_v50 }
  0xf1   : >> { %v534_v46 = vpop.f32.mrf.mxu0 }
  0xf2   : >> { %v571_v34 = vmul.f32 2.0, %v543_v26  ;;  %v535_v35 = vadd.f32 %v534_v46, %v394_v59 }
  0xf3   : >> { %v993_v47 = vpop.f32.mrf.mxu0 }
  0xf4   : >> { %v546_v61 = vadd.f32 %v993_v47, %v409_v48  ;;  %v527_v47 = vadd.f32 %v988_v37, %v384_v33  ;;  %v374_v48 = vpop.permute.xlu0 %373 }
  0xf5   : >> { %v537_v49 = vpop.f32.mrf.mxu0 }
  0xf6   : >> { %v572_v31 = vmul.f32 2.0, %v546_v61  ;;  %v538_v32 = vadd.f32 %v537_v49, %v399_v54 }
  0xf7   : >> { %v996_v51 = vpop.f32.mrf.mxu0 }
  0xf8   : >> { %v559_v52 = vadd.f32 %v996_v51, %v424_v40  ;;  %v570_v40 = vmul.f32 2.0, %v538_v32 }
  0xf9   : >> { %v550_v53 = vpop.f32.mrf.mxu0 }
  0xfa   : >> { %v575_v55 = vmul.f32 2.0, %v559_v52  ;;  %v551_v57 = vadd.f32 %v550_v53, %v414_v38  ;;  %v530_v38 = vadd.f32 %v989_v41, %v389_v30  ;;  %v567_v52 = vmul.f32 2.0, %v527_v47  ;;  %v598_v30 = vpop.permute.xlu0 %597 }
  0xfb   : >> { %v997_v56 = vpop.f32.mrf.mxu0  ;;  %v519_v53 = vadd.f32 %v518_v39, %v374_v48  ;;  %v1212_v48 = vmov (%p363_p11), 0.0  }
  0xfc   : >> { %v562_v58 = vadd.f32 %v997_v56, %v429_v45  ;;  %1095 = vtanh.f32 %v575_v55  ;;  %v573_v27 = vmul.f32 2.0, %v551_v57  ;;  %v379_v45 = vpop.permute.xlu1 %378  ;;  %v568_v44 = vmul.f32 2.0, %v530_v38  ;;  %1014 = vmatprep.subr.bf16.mxu0 (%p363_p11), %v1212_v48  ;;  %1018 = vmatprep.mubr.msk.bf16.mxu0 (%p363_p11), %vm1213_vm5, %v1212_v48 }
  0xfd   : >> { %v553_v60 = vpop.f32.mrf.mxu0  ;;  %v522_v50 = vadd.f32 %v521_v42, %v379_v45  ;;  %v565_v41 = vmul.f32 2.0, %v519_v53 }
  0xfe   : >> { %v576_v62 = vmul.f32 2.0, %v562_v58  ;;  %v554_v63 = vadd.f32 %v553_v60, %v419_v43  ;;  %v569_v43 = vmul.f32 2.0, %v535_v35 }
  0xff   : >> { %v566_v54 = vmul.f32 2.0, %v522_v50 }
 0x100   : >> { %1097 = vtanh.f32 %v576_v62  ;;  %v574_v29 = vmul.f32 2.0, %v554_v63 }
 0x102   : >> { %1099 = vtanh.f32 %v574_v29 }
 0x103   : >> { %1101 = vtanh.f32 %v573_v27 }
 0x104   : >> { %1103 = vtanh.f32 %v572_v31 }
 0x105   : >> { %1105 = vtanh.f32 %v571_v34 }
 0x106   : >> { %1107 = vtanh.f32 %v570_v40 }
 0x107   : >> { %1109 = vtanh.f32 %v569_v43  ;;  %v1123_v43 = vld [vmem:[%s1608_s5 + $0x8] sm:$0xff] (%p363_p11)  }
 0x108   : >> { %1111 = vtanh.f32 %v568_v44  ;;  %1015 = vmatpush3.bf16.msra.mxu0 (%p363_p11), %v1123_v43 }
 0x109   : >> { %v1096_v51 = vpop.eup %1095  ;;  %1113 = vtanh.f32 %v567_v52  ;;  %1016 = vmatprep.subr.bf16.mxu0 (%p363_p11), %v1212_v48 }
 0x10a   : >> { %1115 = vtanh.f32 %v566_v54 }
 0x10b   : >> { %1117 = vtanh.f32 %v565_v41 }
 0x10d   : >> { %v1098_v49 = vpop.eup %1097 }
 0x10e   : >> { %v594_v46 = vpack.c.bf16 %v1098_v49, %v1096_v51 }
 0x10f   : >> { %v1100_v55 = vpop.eup %1099 }
 0x110   : >> { %999 = vmatpush3.bf16.msra.mxu1 %v594_v46  ;;  %v1102_v56 = vpop.eup %1101 }
 0x111   : >> { %1000 = vmatprep.subr.bf16.mxu1 %v1210_v36  ;;  %v593_v37 = vpack.c.bf16 %v1100_v55, %v1102_v56  ;;  %v1104_v57 = vpop.eup %1103 }
 0x112   : >> { %v1106_v42 = vpop.eup %1105 }
 0x113   : >> { %v592_v39 = vpack.c.bf16 %v1104_v57, %v1106_v42  ;;  %v1108_v58 = vpop.eup %1107 }
 0x114   : >> { %1001 = vmatpush3.bf16.msra.mxu1 %v593_v37  ;;  %v1110_v59 = vpop.eup %1109 }
 0x115   : >> { %1002 = vmatprep.subr.bf16.mxu1 %v1210_v36  ;;  %v591_v60 = vpack.c.bf16 %v1108_v58, %v1110_v59  ;;  %v1112_v61 = vpop.eup %1111 }
 0x116   : >> { %v1114_v62 = vpop.eup %1113 }
 0x117   : >> { %v590_v63 = vpack.c.bf16 %v1112_v61, %v1114_v62  ;;  %v1116_v26 = vpop.eup %1115 }
 0x118   : >> { %1003 = vmatpush3.bf16.msra.mxu1 %v592_v39  ;;  %v1118_v27 = vpop.eup %1117 }
 0x119   : >> { %1004 = vmatprep.subr.bf16.mxu1 %v1210_v36  ;;  %v589_v29 = vpack.c.bf16 %v1116_v26, %v1118_v27 }
 0x11c   : >> { %1005 = vmatpush3.bf16.msra.mxu1 %v591_v60 }
 0x11d   : >> { %1006 = vmatprep.subr.bf16.mxu1 %v1210_v36 }
 0x120   : >> { %1007 = vmatpush3.bf16.msra.mxu1 %v590_v63 }
 0x121   : >> { %1008 = vmatprep.subr.bf16.mxu1 %v1210_v36 }
 0x124   : >> { %1009 = vmatpush3.bf16.msra.mxu1 %v589_v29 }
 0x125   : > { %1022 = vmatprep.subr.bf16.mxu1 (%p363_p11), %v1212_v48 }
 0x127   : >> { %1011 = vmatmul.mubr.msk.bf16.vlgmr.msra.gmra.mxu1 %vm600_vm3, %v1447_v24 }
 0x128   : > { %1034 = vmatprep.mubr.msk.bf16.mxu1 (%p363_p11), %vm1213_vm5, %v1212_v48  ;;  %1023 = vmatpush3.bf16.msra.mxu1 (%p363_p11), %v1125_v0 }
 0x129   : > { %1024 = vmatprep.subr.bf16.mxu1 (%p363_p11), %v1212_v48 }
 0x12c   : > { %1025 = vmatpush3.bf16.msra.mxu1 (%p363_p11), %v1126_v1 }
 0x12d   : > { %1026 = vmatprep.subr.bf16.mxu1 (%p363_p11), %v1212_v48 }
 0x130   : > { %1027 = vmatpush3.bf16.msra.mxu1 (%p363_p11), %v1127_v2 }
 0x131   : > { %1028 = vmatprep.subr.bf16.mxu1 (%p363_p11), %v1212_v48 }
 0x134   : > { %1029 = vmatpush3.bf16.msra.mxu1 (%p363_p11), %v1128_v3 }
 0x135   : > { %1030 = vmatprep.subr.bf16.mxu1 (%p363_p11), %v1212_v48 }
 0x138   : > { %1031 = vmatpush3.bf16.msra.mxu1 (%p363_p11), %v1129_v4 }
 0x139   : > { %1032 = vmatprep.subr.bf16.mxu1 (%p363_p11), %v1212_v48 }
 0x13c   : > { %1033 = vmatpush3.bf16.msra.mxu1 (%p363_p11), %v1130_v5 }
 0x1e7   : >> { %v638_v31 = vpop.f32.mrf.mxu1 }
 0x1e8   : >> { %v639_v32 = vadd.f32 %v638_v31, %v598_v30 }
 0x1e9   : >> { %v1012_v33 = vpop.f32.mrf.mxu1 }
 0x1ea   : >> { %v644_v34 = vmul.f32 2.0, %v639_v32 }
 0x1eb   : >> { %v641_v35 = vpop.f32.mrf.mxu1 }
 0x1ec   : >> { %1119 = vtanh.f32 %v644_v34 }
 0x1ed   : >> { %v1013_v38 = vpop.f32.mrf.mxu1 }
 0x1f9   : >> { %v1120_v40 = vpop.eup %1119 }
 0x1fa   : >> { %v646_v45 = vadd.f32 %v1120_v40, %v1468_v28  ;;  %v1124_v28 = vld [vmem:[%s1608_s5] sm:$0xff] (%p363_p11)  }
 0x1fb   : > { %1017 = vmatpush3.bf16.msra.mxu0 (%p363_p11), %v1124_v28 }
 0x1fc   : >> { %v647_v47 = vmul.f32 2.0, %v646_v45 }
 0x1fe   : >> { %1121 = vtanh.f32 %v647_v47 }
 0x208   : > { %365 = sbr.rel (!%p363_p11) target bundleno = 30 (0x1e), region = 100 }
 0x20b   : >> { %v1122_v36 = vpop.eup %1121 }
 0x20c   : >> { %651 = vst.msk [vmem:[%s649_s22] sm:$0xff] %vm650_vm4, %v1122_v36 }
 0x213   : > { %v652_v44 = vld [vmem:[#allocation2] sm:$0xff]  ;;  %v653_v50 = vld [vmem:[#allocation2 + $0x8] sm:$0xff] }
 0x214   : > { %v654_v51 = vpack.c.bf16 %v653_v50, %v652_v44 }
 0x216   : > { %1019 = vmatmul.mubr.msk.bf16.vlgmr.msra.gmra.mxu0 %vm650_vm4, %v654_v51 }
 0x2d6   : > { %v716_v7 = vpop.f32.mrf.mxu0 }
 0x2d7   : > { %v717_v8 = vadd.f32 %v942_v6, %v716_v7 }
 0x2d8   : > { %v1020_v9 = vpop.f32.mrf.mxu0 }
 0x2d9   : > { %v723_v10 = vmul.f32 2.0, %v717_v8 }
 0x2da   : > { %v719_v11 = vpop.f32.mrf.mxu0 }
 0x2db   : > { %v720_v12 = vadd.f32 %v942_v6, %v719_v11  ;;  %1131 = vtanh.f32 %v723_v10 }
 0x2dc   : > { %v1021_v13 = vpop.f32.mrf.mxu0 }
 0x2dd   : > { %v724_v14 = vmul.f32 2.0, %v720_v12 }
 0x2df   : > { %1133 = vtanh.f32 %v724_v14 }
 0x2e8   : > { %v1132_v15 = vpop.eup %1131 }
 0x2ec   : > { %v1134_v16 = vpop.eup %1133 }
 0x2ed   : > { %v727_v17 = vpack.c.bf16 %v1134_v16, %v1132_v15 }
 0x2ef   : > { %1035 = vmatmul.mubr.msk.bf16.vlgmr.msra.gmra.mxu1 %vm600_vm3, %v727_v17 }
 0x3af   : > { %v821_v19 = vpop.f32.mrf.mxu1 }
 0x3b0   : > { %v822_v20 = vadd.f32 %v946_v18, %v821_v19 }
 0x3b1   : > { %v1036_v21 = vpop.f32.mrf.mxu1 }
 0x3b2   : > { %v828_v22 = vadd.f32 %v822_v20, %v652_v44 }
 0x3b3   : > { %v824_v23 = vpop.f32.mrf.mxu1 }
 0x3b4   : > { %v830_v24 = vmul.f32 2.0, %v828_v22  ;;  %v825_v25 = vadd.f32 %v946_v18, %v824_v23 }
 0x3b5   : > { %v1037_v52 = vpop.f32.mrf.mxu1 }
 0x3b6   : > { %1135 = vtanh.f32 %v830_v24  ;;  %v829_v53 = vadd.f32 %v825_v25, %v653_v50 }
 0x3b8   : > { %v831_v49 = vmul.f32 2.0, %v829_v53 }
 0x3ba   : > { %1137 = vtanh.f32 %v831_v49 }
 0x3c3   : > { %v1136_v54 = vpop.eup %1135 }
 0x3c4   : > { %834 = vst.msk [vmem:[%s1454_s26] sm:$0xff] %vm650_vm4, %v1136_v54 }
 0x3c7   : > { %v1138_v46 = vpop.eup %1137 }
 0x3c8   : > { %835 = vst.msk [vmem:[%s1454_s26 + $0x8] sm:$0xff] %vm650_vm4, %v1138_v46 }
 0x3c9   : > { %1152 = shalt.err (!%p1149_p4)
}
 0x3ca   : > { %s1153_s26 = scalar_lea.hbm %s1555_s16, 256  ;;  %s1157_s18 = scalar_lea.hbm %s1612_s9, 512 }
 0x3cb   : > { %p1154_p7 = scmp.ne.s32.totalorder %s1555_s16, %s1153_s26  ;;  %p1158_p10 = scmp.lt.s32.totalorder %s1555_s16, %s1612_s9 }
 0x3cc   : > { %p1159_p11 = scmp.lt.s32.totalorder %s1157_s18, %s1153_s26 }
 0x3cd   : > { %p1155_p8 = pnand %p1154_p7, %p1305_p5 }
 0x3ce   : > { %p1160_p12 = por %p1159_p11, %p1158_p10 }
 0x3cf   : > { %p1156_p9 = pneg %p1155_p8 }
 0x3d1   : > { %p1161_p13 = pnand %p1160_p12, %p1156_p9 }
 0x3d3   : > { %1164 = shalt.err (!%p1161_p13)
}
 0x3d4   : > { %s1215_s17 = smov 128   ;;  %s1216_s13 = smov 8  }
 0x3d5   : > { %1039 = dma.vmem_to_hbm [thread:$0]  (%p1305_p5), %s1557_s28, 256, %s1555_s16, %s1563_s23, %s1215_s17, %s1215_s17, %s1216_s13  }
 0x3d6 PF: > { %p1045_p0 = scmp.ge.s32.totalorder %s1203_s12, 2  ;;  %s865_s24 = sand.u32 1, %s1191_s30  }
 0x3d7   : > { %s866_s29 = scalar_lea.sflag [#allocation4], %s865_s24 }
 0x3d8   : > { %p1042_p1 = pnand %p1045_p0, %p1309_p6 }
 0x3da   : > { %p1043_p2 = pneg %p1042_p1 }
 0x3dc   : > { %1186 = dma.done.wait (%p1043_p2), %s866_s29, 256  }
 0x3dd   : > { %1188 = vsyncadd (%p1043_p2), %s866_s29, 4294967040  ;;  %s1618_s21 = sld [smem:[#allocation6_spill]]  ;;  %p19_p3 = scmp.ge.s32.totalorder %s1292_s15, 4  }
 0x3de   : > { %s1619_s30 = smov %s1195_s10  ;;  %s1620_s10 = smov %s1199_s11 }
 0x3df   : > { %s1622_s12 = smov %s1292_s15  ;;  %21 = sbr.rel (!%p19_p3) target bundleno = 3 (0x3), region = 111 }
 0x3e3   : > { %s1621_s11 = smov %s1618_s21 }
 0x3e4   :  { %871 = vsyncpa [#allocation4], 1 }
 0x3e5   :  { %873 = vsyncpa [#allocation4 + $0x1], 1 }

// kernel: bitmixer_forward.2
= control target key start
LH: loop header
LB: loop body
LE: loop exit
PB: predicated region body
PF: predicated region fallthrough
CT: control target
= control target key end

     0   :  { %s1157_s30 = smov 0   ;;  %s1404_s0 = inlined_call_operand.vmem [shape: f32[4,8,32], index: 0, kind: input, shape index: {}]   ;;  %s1405_s1 = inlined_call_operand.vmem [shape: bf16[96,8], index: 1, kind: input, shape index: {}]   ;;  %s1406_s2 = inlined_call_operand.vmem [shape: f32[96,1], index: 2, kind: input, shape index: {}]   ;;  %s1407_s3 = inlined_call_operand.vmem [shape: bf16[8,96], index: 3, kind: input, shape index: {}]   ;;  %s1408_s4 = inlined_call_operand.vmem [shape: f32[8,1], index: 4, kind: input, shape index: {}]   ;;  %s1409_s5 = inlined_call_operand.vmem [shape: bf16[32,96], index: 5, kind: input, shape index: {}]   ;;  %s1410_s6 = inlined_call_operand.vmem [shape: f32[1,96], index: 6, kind: input, shape index: {}]   ;;  %s1411_s7 = inlined_call_operand.vmem [shape: bf16[96,32], index: 7, kind: input, shape index: {}]   ;;  %s1412_s8 = inlined_call_operand.vmem [shape: f32[1,32], index: 8, kind: input, shape index: {}]   ;;  %s1413_s9 = inlined_call_operand.vmem [shape: f32[4,8,32], index: 9, kind: output, shape index: {}]  }
   0x1 LB: > { %s903_s10 = sadd.s32 4294967295, %s1096_s30   ;;  %p907_p0 = scmp.ge.s32.totalorder %s1096_s30, 1  ;;  %s1096_s30 = sphi %s1157_s30, %s19_s30  }
   0x2   : > { %p288_p1 = scmp.lt.s32.totalorder %s1096_s30, 3 }
   0x4   : > { %p289_p2 = pnand %p907_p0, %p288_p1 }
   0x5   : > { %s908_s11 = sshll.u32 (!%p289_p2), %s903_s10, 1 }
   0x6   : > { %292 = sbr.rel (%p289_p2) target bundleno = 960 (0x3c0), region = 56  ;;  %p325_p3 = scmp.lt.s32.totalorder (!%p289_p2), %s908_s11, 3 }
   0xb   : > { %v1168_v0 = vld [vmem:[%s1405_s1] sm:$0xf]  ;;  %v1173_v1 = vld [vmem:[%s1405_s1 + $0x4] sm:$0xf]  ;;  %v1183_v3 = vld [vmem:[%s1405_s1 + $0x8] sm:$0xf] }
   0xc   : > { %v1178_v2 = vld [vmem:[%s1406_s2] sm:$0xff]  ;;  %v1188_v4 = vld [vmem:[%s1405_s1 + $0xc] sm:$0xf]  ;;  %v1198_v6 = vld [vmem:[%s1405_s1 + $0x10] sm:$0xf]  ;;  %s1415_s11 = smov (!%p325_p3, %s908_s11), 3 }
   0xd   : > { %v1193_v5 = vld [vmem:[%s1406_s2 + $0x8] sm:$0xff]  ;;  %v1203_v7 = vld [vmem:[%s1405_s1 + $0x14] sm:$0xf]  ;;  %v1208_v8 = vld [vmem:[%s1405_s1 + $0x18] sm:$0xf]  ;;  %s909_s23 = sshll.u32 %s1415_s11, 3 }
   0xe   : > { %v1213_v9 = vld [vmem:[%s1405_s1 + $0x1c] sm:$0xf]  ;;  %v1218_v10 = vld [vmem:[%s1405_s1 + $0x20] sm:$0xf]  ;;  %v1223_v11 = vld [vmem:[%s1406_s2 + $0x10] sm:$0xff]  ;;  %s1258_s13 = scalar_lea.vmem %s1404_s0, %s909_s23  ;;  %s1263_s15 = scalar_lea.vmem %s1413_s9, %s909_s23 }
   0xf   : > { %v1228_v12 = vld [vmem:[%s1405_s1 + $0x24] sm:$0xf]  ;;  %v1233_v13 = vld [vmem:[%s1405_s1 + $0x28] sm:$0xf]  ;;  %v1238_v14 = vld [vmem:[%s1405_s1 + $0x2c] sm:$0xf] }
  0x10   : > { %v1243_v15 = vld [vmem:[%s1406_s2 + $0x18] sm:$0xff]  ;;  %v1248_v16 = vld [vmem:[%s1406_s2 + $0x20] sm:$0xff]  ;;  %v1253_v17 = vld [vmem:[%s1406_s2 + $0x28] sm:$0xff]  ;;  %s1305_s11 = smov 0  }
  0x11   : > { %v1268_v18 = vld [vmem:[%s1406_s2 + $0x30] sm:$0xff]  ;;  %v1273_v19 = vld [vmem:[%s1406_s2 + $0x38] sm:$0xff]  ;;  %v1278_v20 = vld [vmem:[%s1406_s2 + $0x40] sm:$0xff] }
  0x12   : > { %v1283_v21 = vld [vmem:[%s1406_s2 + $0x48] sm:$0xff]  ;;  %v1288_v22 = vld [vmem:[%s1406_s2 + $0x50] sm:$0xff]  ;;  %v1293_v23 = vld [vmem:[%s1406_s2 + $0x58] sm:$0xff] }
  0x13   : > { %v1298_v24 = vld [vmem:[%s1407_s3] sm:$0xf] }
  0x14   : > { %v1303_v25 = vld [vmem:[%s1408_s4] sm:$0xff] }
  0x15 LB: >> { %v913_v26 = vcombine.low %v1168_v0, %v1173_v1  ;;  %vm463_vm0 = vcmask 64512   ;;  %s912_s14 = sshll.u32 %s1100_s11, 3  ;;  %v1102_v27 = vmov 0   ;;  %vm482_vm1 = vcmask 1043456   ;;  %s368_s11 = sadd.s32 1, %s1100_s11   ;;  %s1100_s11 = sphi %s1305_s11, %s368_s11  }
  0x16   : >> { %s370_s16 = scalar_lea.vmem %s1258_s13, %s912_s14  ;;  %1040 = vset.pattern.permute.xlu0 %v1102_v27  ;;  %1041 = vset.pattern.permute.xlu1 %v1102_v27  ;;  %v914_v31 = vcombine.low %v1183_v3, %v1188_v4  ;;  %v915_v32 = vcombine.low %v1198_v6, %v1203_v7  ;;  %v916_v33 = vcombine.low %v1208_v8, %v1213_v9  ;;  %v1103_v36 = vmov 0.0   ;;  %s651_s17 = scalar_lea.vmem [#allocation2], %s912_s14 }
  0x17   : >> { %966 = vmatprep.mubr.msk.bf16.mxu0 %vm463_vm0, %v913_v26  ;;  %v1317_v28 = vld [vmem:[%s370_s16] sm:$0xff]  ;;  %425 = vperm.xlu0 %1040, %v1288_v22   ;;  %v917_v34 = vcombine.low %v1218_v10, %v1228_v12  ;;  %v918_v35 = vcombine.low %v1233_v13, %v1238_v14  ;;  %vm1104_vm2 = vmmov 0   ;;  %vm602_vm3 = vcmask 785408   ;;  %p365_p4 = scmp.ge.s32.totalorder %s368_s11, 2  }
  0x18   : >> { %415 = vperm.xlu1 %1041, %v1278_v20   ;;  %v372_v29 = vpack.c.bf16 %v1317_v28, %v1317_v28  ;;  %978 = vmatprep.subr.bf16.mxu1 %v1103_v36  ;;  %vm652_vm4 = vcmask 261120   ;;  %vm1106_vm5 = vmmov (%p365_p4), 0   ;;  %v1072_v0 = vld [vmem:[%s1411_s7 + $0x28] sm:$0xff] (%p365_p4)   ;;  %v1073_v1 = vld [vmem:[%s1411_s7 + $0x20] sm:$0xff] (%p365_p4)   ;;  %v1075_v3 = vld [vmem:[%s1411_s7 + $0x10] sm:$0xff] (%p365_p4)  }
  0x19   : >> { %990 = vmatprep.mubr.msk.bf16.mxu1 %vm1104_vm2, %v1103_v36  ;;  %v1076_v4 = vld [vmem:[%s1411_s7 + $0x8] sm:$0xff] (%p365_p4)   ;;  %v926_v6 = vld [vmem:[%s1410_s6] ss:$0 sm:$0xff] (%p365_p4) }
  0x1a   : >> { %1018 = vmatprep.subr.msk.bf16.mxu0 %vm482_vm1, %v372_v29  ;;  %v484_v30 = vsel %vm482_vm1, %v372_v29, 0 }
  0x1b   : >> { %965 = vmatpush3.bf16.msra.mxu0 %v484_v30  ;;  %430 = vperm.xlu0 %1040, %v1293_v23  }
  0x1c   : >> { %420 = vperm.xlu1 %1041, %v1283_v21  }
  0x1e   : >> { %967 = vmatmul.mubr.msk.bf16.vlgmr.msra.gmra.mxu0 %vm463_vm0, %v914_v31 }
  0x1f   : >> { %970 = vmatprep.mubr.msk.bf16.mxu0 %vm463_vm0, %v915_v32  ;;  %405 = vperm.xlu0 %1040, %v1268_v18   ;;  %v930_v18 = vld [vmem:[%s1412_s8] ss:$0 sm:$0xff] (%p365_p4) }
  0x20   : >> { %410 = vperm.xlu1 %1041, %v1273_v19  }
  0x23   : >> { %395 = vperm.xlu0 %1040, %v1248_v16  }
  0x24   : >> { %400 = vperm.xlu1 %1041, %v1253_v17  }
  0x26   : >> { %971 = vmatmul.mubr.msk.bf16.gmra.mxu0 %vm463_vm0, %v916_v33 }
  0x27   : >> { %974 = vmatprep.mubr.msk.bf16.mxu0 %vm463_vm0, %v917_v34  ;;  %385 = vperm.xlu0 %1040, %v1223_v11  }
  0x28   : >> { %390 = vperm.xlu1 %1041, %v1243_v15  }
  0x2b   : >> { %375 = vperm.xlu0 %1040, %v1178_v2   ;;  %v1074_v2 = vld [vmem:[%s1411_s7 + $0x18] sm:$0xff] (%p365_p4)  }
  0x2c   : >> { %380 = vperm.xlu1 %1041, %v1193_v5   ;;  %v1077_v5 = vld [vmem:[%s1411_s7] sm:$0xff] (%p365_p4)  }
  0x2e   : >> { %975 = vmatmul.mubr.msk.bf16.gmra.mxu0 %vm463_vm0, %v918_v35 }
  0x2f   : >> { %599 = vperm.xlu0 %1040, %v1303_v25  }
  0x92   : >> { %v426_v40 = vpop.permute.xlu0 %425 }
  0x93   : >> { %v416_v38 = vpop.permute.xlu1 %415 }
  0x96   : >> { %v431_v45 = vpop.permute.xlu0 %430 }
  0x97   : >> { %v421_v43 = vpop.permute.xlu1 %420 }
  0x9a   : >> { %v406_v50 = vpop.permute.xlu0 %405 }
  0x9b   : >> { %v411_v48 = vpop.permute.xlu1 %410 }
  0x9e   : >> { %v396_v59 = vpop.permute.xlu0 %395 }
  0x9f   : >> { %v401_v54 = vpop.permute.xlu1 %400 }
  0xa2   : >> { %v386_v33 = vpop.permute.xlu0 %385 }
  0xa3   : >> { %v391_v30 = vpop.permute.xlu1 %390 }
  0xde   : >> { %v968_v37 = vpop.f32.mrf.mxu0 }
  0xe0   : >> { %v520_v39 = vpop.f32.mrf.mxu0 }
  0xe2   : >> { %v969_v41 = vpop.f32.mrf.mxu0 }
  0xe4   : >> { %v523_v42 = vpop.f32.mrf.mxu0 }
  0xe6   : >> { %v972_v44 = vpop.f32.mrf.mxu0 }
  0xe7   : >> { %v545_v26 = vadd.f32 %v972_v44, %v406_v50 }
  0xe8   : >> { %v536_v46 = vpop.f32.mrf.mxu0 }
  0xe9   : >> { %v573_v34 = vmul.f32 2.0, %v545_v26  ;;  %v537_v35 = vadd.f32 %v536_v46, %v396_v59 }
  0xea   : >> { %v973_v47 = vpop.f32.mrf.mxu0 }
  0xeb   : >> { %v548_v61 = vadd.f32 %v973_v47, %v411_v48  ;;  %v529_v47 = vadd.f32 %v968_v37, %v386_v33  ;;  %v376_v48 = vpop.permute.xlu0 %375 }
  0xec   : >> { %v539_v49 = vpop.f32.mrf.mxu0 }
  0xed   : >> { %v574_v31 = vmul.f32 2.0, %v548_v61  ;;  %v540_v32 = vadd.f32 %v539_v49, %v401_v54 }
  0xee   : >> { %v976_v51 = vpop.f32.mrf.mxu0 }
  0xef   : >> { %v561_v52 = vadd.f32 %v976_v51, %v426_v40  ;;  %v572_v40 = vmul.f32 2.0, %v540_v32 }
  0xf0   : >> { %v552_v53 = vpop.f32.mrf.mxu0 }
  0xf1   : >> { %v577_v55 = vmul.f32 2.0, %v561_v52  ;;  %v553_v57 = vadd.f32 %v552_v53, %v416_v38  ;;  %v532_v38 = vadd.f32 %v969_v41, %v391_v30  ;;  %v569_v52 = vmul.f32 2.0, %v529_v47  ;;  %v600_v30 = vpop.permute.xlu0 %599 }
  0xf2   : >> { %v977_v56 = vpop.f32.mrf.mxu0  ;;  %v521_v53 = vadd.f32 %v520_v39, %v376_v48  ;;  %v1105_v48 = vmov (%p365_p4), 0.0  }
  0xf3   : >> { %v564_v58 = vadd.f32 %v977_v56, %v431_v45  ;;  %1042 = vtanh.f32 %v577_v55  ;;  %v575_v27 = vmul.f32 2.0, %v553_v57  ;;  %v381_v45 = vpop.permute.xlu1 %380  ;;  %v570_v44 = vmul.f32 2.0, %v532_v38  ;;  %994 = vmatprep.subr.bf16.mxu0 (%p365_p4), %v1105_v48  ;;  %998 = vmatprep.mubr.msk.bf16.mxu0 (%p365_p4), %vm1106_vm5, %v1105_v48 }
  0xf4   : >> { %v555_v60 = vpop.f32.mrf.mxu0  ;;  %v524_v50 = vadd.f32 %v523_v42, %v381_v45  ;;  %v567_v41 = vmul.f32 2.0, %v521_v53 }
  0xf5   : >> { %v578_v62 = vmul.f32 2.0, %v564_v58  ;;  %v556_v63 = vadd.f32 %v555_v60, %v421_v43  ;;  %v571_v43 = vmul.f32 2.0, %v537_v35 }
  0xf6   : >> { %v568_v54 = vmul.f32 2.0, %v524_v50 }
  0xf7   : >> { %1044 = vtanh.f32 %v578_v62  ;;  %v576_v29 = vmul.f32 2.0, %v556_v63 }
  0xf9   : >> { %1046 = vtanh.f32 %v576_v29 }
  0xfa   : >> { %1048 = vtanh.f32 %v575_v27 }
  0xfb   : >> { %1050 = vtanh.f32 %v574_v31 }
  0xfc   : >> { %1052 = vtanh.f32 %v573_v34 }
  0xfd   : >> { %1054 = vtanh.f32 %v572_v40 }
  0xfe   : >> { %1056 = vtanh.f32 %v571_v43  ;;  %v1070_v43 = vld [vmem:[%s1409_s5 + $0x8] sm:$0xff] (%p365_p4)  }
  0xff   : >> { %1058 = vtanh.f32 %v570_v44  ;;  %995 = vmatpush3.bf16.msra.mxu0 (%p365_p4), %v1070_v43 }
 0x100   : >> { %v1043_v51 = vpop.eup %1042  ;;  %1060 = vtanh.f32 %v569_v52  ;;  %996 = vmatprep.subr.bf16.mxu0 (%p365_p4), %v1105_v48 }
 0x101   : >> { %1062 = vtanh.f32 %v568_v54 }
 0x102   : >> { %1064 = vtanh.f32 %v567_v41 }
 0x104   : >> { %v1045_v49 = vpop.eup %1044 }
 0x105   : >> { %v596_v46 = vpack.c.bf16 %v1045_v49, %v1043_v51 }
 0x106   : >> { %v1047_v55 = vpop.eup %1046 }
 0x107   : >> { %979 = vmatpush3.bf16.msra.mxu1 %v596_v46  ;;  %v1049_v56 = vpop.eup %1048 }
 0x108   : >> { %980 = vmatprep.subr.bf16.mxu1 %v1103_v36  ;;  %v595_v37 = vpack.c.bf16 %v1047_v55, %v1049_v56  ;;  %v1051_v57 = vpop.eup %1050 }
 0x109   : >> { %v1053_v42 = vpop.eup %1052 }
 0x10a   : >> { %v594_v39 = vpack.c.bf16 %v1051_v57, %v1053_v42  ;;  %v1055_v58 = vpop.eup %1054 }
 0x10b   : >> { %981 = vmatpush3.bf16.msra.mxu1 %v595_v37  ;;  %v1057_v59 = vpop.eup %1056 }
 0x10c   : >> { %982 = vmatprep.subr.bf16.mxu1 %v1103_v36  ;;  %v593_v60 = vpack.c.bf16 %v1055_v58, %v1057_v59  ;;  %v1059_v61 = vpop.eup %1058 }
 0x10d   : >> { %v1061_v62 = vpop.eup %1060 }
 0x10e   : >> { %v592_v63 = vpack.c.bf16 %v1059_v61, %v1061_v62  ;;  %v1063_v26 = vpop.eup %1062 }
 0x10f   : >> { %983 = vmatpush3.bf16.msra.mxu1 %v594_v39  ;;  %v1065_v27 = vpop.eup %1064 }
 0x110   : >> { %984 = vmatprep.subr.bf16.mxu1 %v1103_v36  ;;  %v591_v29 = vpack.c.bf16 %v1063_v26, %v1065_v27 }
 0x113   : >> { %985 = vmatpush3.bf16.msra.mxu1 %v593_v60 }
 0x114   : >> { %986 = vmatprep.subr.bf16.mxu1 %v1103_v36 }
 0x117   : >> { %987 = vmatpush3.bf16.msra.mxu1 %v592_v63 }
 0x118   : >> { %988 = vmatprep.subr.bf16.mxu1 %v1103_v36 }
 0x11b   : >> { %989 = vmatpush3.bf16.msra.mxu1 %v591_v29 }
 0x11c   : > { %1002 = vmatprep.subr.bf16.mxu1 (%p365_p4), %v1105_v48 }
 0x11e   : >> { %991 = vmatmul.mubr.msk.bf16.vlgmr.msra.gmra.mxu1 %vm602_vm3, %v1298_v24 }
 0x11f   : > { %1014 = vmatprep.mubr.msk.bf16.mxu1 (%p365_p4), %vm1106_vm5, %v1105_v48  ;;  %1003 = vmatpush3.bf16.msra.mxu1 (%p365_p4), %v1072_v0 }
 0x120   : > { %1004 = vmatprep.subr.bf16.mxu1 (%p365_p4), %v1105_v48 }
 0x123   : > { %1005 = vmatpush3.bf16.msra.mxu1 (%p365_p4), %v1073_v1 }
 0x124   : > { %1006 = vmatprep.subr.bf16.mxu1 (%p365_p4), %v1105_v48 }
 0x127   : > { %1007 = vmatpush3.bf16.msra.mxu1 (%p365_p4), %v1074_v2 }
 0x128   : > { %1008 = vmatprep.subr.bf16.mxu1 (%p365_p4), %v1105_v48 }
 0x12b   : > { %1009 = vmatpush3.bf16.msra.mxu1 (%p365_p4), %v1075_v3 }
 0x12c   : > { %1010 = vmatprep.subr.bf16.mxu1 (%p365_p4), %v1105_v48 }
 0x12f   : > { %1011 = vmatpush3.bf16.msra.mxu1 (%p365_p4), %v1076_v4 }
 0x130   : > { %1012 = vmatprep.subr.bf16.mxu1 (%p365_p4), %v1105_v48 }
 0x133   : > { %1013 = vmatpush3.bf16.msra.mxu1 (%p365_p4), %v1077_v5 }
 0x1de   : >> { %v640_v31 = vpop.f32.mrf.mxu1 }
 0x1df   : >> { %v641_v32 = vadd.f32 %v640_v31, %v600_v30 }
 0x1e0   : >> { %v992_v33 = vpop.f32.mrf.mxu1 }
 0x1e1   : >> { %v646_v34 = vmul.f32 2.0, %v641_v32 }
 0x1e2   : >> { %v643_v35 = vpop.f32.mrf.mxu1 }
 0x1e3   : >> { %1066 = vtanh.f32 %v646_v34 }
 0x1e4   : >> { %v993_v38 = vpop.f32.mrf.mxu1 }
 0x1f0   : >> { %v1067_v40 = vpop.eup %1066 }
 0x1f1   : >> { %v648_v45 = vadd.f32 %v1067_v40, %v1317_v28  ;;  %v1071_v28 = vld [vmem:[%s1409_s5] sm:$0xff] (%p365_p4)  }
 0x1f2   : > { %997 = vmatpush3.bf16.msra.mxu0 (%p365_p4), %v1071_v28 }
 0x1f3   : >> { %v649_v47 = vmul.f32 2.0, %v648_v45 }
 0x1f5   : >> { %1068 = vtanh.f32 %v649_v47 }
 0x1ff   : > { %367 = sbr.rel (!%p365_p4) target bundleno = 21 (0x15), region = 95 }
 0x202   : >> { %v1069_v36 = vpop.eup %1068 }
 0x203   : >> { %653 = vst.msk [vmem:[%s651_s17] sm:$0xff] %vm652_vm4, %v1069_v36 }
 0x20a   : > { %v654_v44 = vld [vmem:[#allocation2] sm:$0xff]  ;;  %v655_v50 = vld [vmem:[#allocation2 + $0x8] sm:$0xff] }
 0x20b   : > { %v656_v51 = vpack.c.bf16 %v655_v50, %v654_v44 }
 0x20d   : > { %999 = vmatmul.mubr.msk.bf16.vlgmr.msra.gmra.mxu0 %vm652_vm4, %v656_v51 }
 0x2cd   : > { %v718_v7 = vpop.f32.mrf.mxu0 }
 0x2ce   : > { %v719_v8 = vadd.f32 %v926_v6, %v718_v7 }
 0x2cf   : > { %v1000_v9 = vpop.f32.mrf.mxu0 }
 0x2d0   : > { %v725_v10 = vmul.f32 2.0, %v719_v8 }
 0x2d1   : > { %v721_v11 = vpop.f32.mrf.mxu0 }
 0x2d2   : > { %v722_v12 = vadd.f32 %v926_v6, %v721_v11  ;;  %1078 = vtanh.f32 %v725_v10 }
 0x2d3   : > { %v1001_v13 = vpop.f32.mrf.mxu0 }
 0x2d4   : > { %v726_v14 = vmul.f32 2.0, %v722_v12 }
 0x2d6   : > { %1080 = vtanh.f32 %v726_v14 }
 0x2df   : > { %v1079_v15 = vpop.eup %1078 }
 0x2e3   : > { %v1081_v16 = vpop.eup %1080 }
 0x2e4   : > { %v729_v17 = vpack.c.bf16 %v1081_v16, %v1079_v15 }
 0x2e6   : > { %1015 = vmatmul.mubr.msk.bf16.vlgmr.msra.gmra.mxu1 %vm602_vm3, %v729_v17 }
 0x3a6   : > { %v823_v19 = vpop.f32.mrf.mxu1 }
 0x3a7   : > { %v824_v20 = vadd.f32 %v930_v18, %v823_v19 }
 0x3a8   : > { %v1016_v21 = vpop.f32.mrf.mxu1 }
 0x3a9   : > { %v830_v22 = vadd.f32 %v824_v20, %v654_v44 }
 0x3aa   : > { %v826_v23 = vpop.f32.mrf.mxu1 }
 0x3ab   : > { %v832_v24 = vmul.f32 2.0, %v830_v22  ;;  %v827_v25 = vadd.f32 %v930_v18, %v826_v23 }
 0x3ac   : > { %v1017_v52 = vpop.f32.mrf.mxu1 }
 0x3ad   : > { %1082 = vtanh.f32 %v832_v24  ;;  %v831_v53 = vadd.f32 %v827_v25, %v655_v50 }
 0x3af   : > { %v833_v49 = vmul.f32 2.0, %v831_v53 }
 0x3b1   : > { %1084 = vtanh.f32 %v833_v49 }
 0x3ba   : > { %v1083_v54 = vpop.eup %1082 }
 0x3bb   : > { %836 = vst.msk [vmem:[%s1263_s15] sm:$0xff] %vm652_vm4, %v1083_v54 }
 0x3be   : > { %v1085_v46 = vpop.eup %1084 }
 0x3bf   : > { %837 = vst.msk [vmem:[%s1263_s15 + $0x8] sm:$0xff] %vm652_vm4, %v1085_v46 }
 0x3c0 PF: > { %s19_s30 = sadd.s32 1, %s1096_s30  }
 0x3c1   : > { %p16_p5 = scmp.ge.s32.totalorder %s19_s30, 4  }
 0x3c3   :  { %18 = sbr.rel (!%p16_p5) target bundleno = 1 (0x1), region = 106 }

// kernel: bitmixer_forward.3
= control target key start
LH: loop header
LB: loop body
LE: loop exit
PB: predicated region body
PF: predicated region fallthrough
CT: control target
= control target key end

     0   :  { %14 = vsyncpa [#allocation4], 0  ;;  %s1603_s0 = inlined_call_operand.vmem [shape: f32[4,8,32], index: 0, kind: input, shape index: {}]   ;;  %s1604_s1 = inlined_call_operand.vmem [shape: bf16[96,8], index: 1, kind: input, shape index: {}]   ;;  %s1605_s2 = inlined_call_operand.vmem [shape: f32[96,1], index: 2, kind: input, shape index: {}]   ;;  %s1606_s3 = inlined_call_operand.vmem [shape: bf16[8,96], index: 3, kind: input, shape index: {}]   ;;  %s1607_s4 = inlined_call_operand.vmem [shape: f32[8,1], index: 4, kind: input, shape index: {}]   ;;  %s1608_s5 = inlined_call_operand.vmem [shape: bf16[32,96], index: 5, kind: input, shape index: {}]   ;;  %s1609_s6 = inlined_call_operand.vmem [shape: f32[1,96], index: 6, kind: input, shape index: {}]   ;;  %s1610_s7 = inlined_call_operand.vmem [shape: bf16[96,32], index: 7, kind: input, shape index: {}]   ;;  %s1611_s8 = inlined_call_operand.vmem [shape: f32[1,32], index: 8, kind: input, shape index: {}]   ;;  %s1612_s9 = inlined_call_operand.hbm [shape: f32[4,8,32], index: 9, kind: output, shape index: {}]  }
   0x1   :  { %16 = vsyncpa [#allocation4 + $0x1], 0  ;;  %s1267_s30 = smov 0   ;;  %s1269_s10 = smov 0  }
   0x2   :  { %s1271_s11 = smov 0   ;;  %s1273_s12 = smov 0  }
   0x3 LB: > { %s1288_s13 = sadd.s32 4294967295, %s1203_s12   ;;  %s921_s14 = sadd.s32 4294967294, %s1203_s12   ;;  %s1203_s12 = sphi %s1273_s12, %s1622_s12   ;;  %s1199_s11 = sphi %s1271_s11, %s1621_s11   ;;  %s1195_s10 = sphi %s1269_s10, %s1620_s10   ;;  %s1191_s30 = sphi %s1267_s30, %s1619_s30  }
   0x4   : > { %s1292_s15 = sadd.s32 1, %s1203_s12   ;;  %s223_s16 = sadd.s32 1, %s1199_s11 }
   0x5   : > { %s220_s17 = ssub.s32 %s1203_s12, %s1292_s15  ;;  %p233_p0 = scmp.ne.s32.totalorder %s1199_s11, %s1195_s10 }
   0x6   : > { %p221_p1 = scmp.eq.s32.totalorder %s220_s17, 0  ;;  %p234_p2 = scmp.eq.s32.totalorder %s1288_s13, 1 }
   0x7   : > { %p239_p3 = scmp.ne.s32.totalorder %s1195_s10, %s1191_s30  ;;  %p240_p4 = scmp.eq.s32.totalorder %s921_s14, 1 }
   0x8   : > { %s1303_s18 = scalar_select %p221_p1, %s1199_s11, %s223_s16  }
   0x9   : > { %p1305_p5 = por %p234_p2, %p233_p0  ;;  %p1309_p6 = por %p240_p4, %p239_p3 }
   0xa   : > { %1614 = sst [smem:[#allocation6_spill]] %s1303_s18  ;;  %p924_p7 = scmp.ge.s32.totalorder %s1203_s12, 1 }
   0xb   : > { %p291_p8 = scmp.lt.s32.totalorder %s1203_s12, 3 }
   0xd   : > { %p292_p9 = pnand %p924_p7, %p291_p8 }
   0xe   : > { %s1613_s21 = sand.u32 (!%p292_p9), 1, %s1195_s10   ;;  %s926_s22 = sshll.u32 (!%p292_p9), %s1288_s13, 1 }
   0xf   : > { %295 = sbr.rel (%p292_p9) target bundleno = 982 (0x3d6), region = 56  ;;  %s925_s27 = sshll.u32 (!%p292_p9), %s1613_s21, 4 }
  0x10   : > { %p328_p10 = scmp.lt.s32.totalorder (!%p292_p9), %s926_s22, 3  ;;  %s1454_s26 = scalar_lea.vmem (!%p292_p9), [#allocation3], %s925_s27 }
  0x11   : > { %s1456_s18 = smov (!%p292_p9), 0  }
  0x14   : > { %v1320_v0 = vld [vmem:[%s1604_s1] sm:$0xf]  ;;  %v1325_v1 = vld [vmem:[%s1604_s1 + $0x4] sm:$0xf]  ;;  %v1332_v2 = vld [vmem:[%s1604_s1 + $0x8] sm:$0xf] }
  0x15   : > { %v1337_v3 = vld [vmem:[%s1604_s1 + $0xc] sm:$0xf]  ;;  %v1342_v4 = vld [vmem:[%s1604_s1 + $0x10] sm:$0xf]  ;;  %v1347_v5 = vld [vmem:[%s1604_s1 + $0x14] sm:$0xf] }
  0x16   : > { %v1352_v6 = vld [vmem:[%s1605_s2] sm:$0xff]  ;;  %s1624_s22 = smov (!%p328_p10, %s926_s22), 3  ;;  %v1357_v7 = vld [vmem:[%s1604_s1 + $0x18] sm:$0xf]  ;;  %v1362_v8 = vld [vmem:[%s1604_s1 + $0x1c] sm:$0xf] }
  0x17   : > { %v1367_v9 = vld [vmem:[%s1605_s2 + $0x8] sm:$0xff]  ;;  %v1372_v10 = vld [vmem:[%s1604_s1 + $0x20] sm:$0xf]  ;;  %v1377_v11 = vld [vmem:[%s1604_s1 + $0x24] sm:$0xf]  ;;  %s927_s14 = sshll.u32 %s1624_s22, 3 }
  0x18   : > { %v1382_v12 = vld [vmem:[%s1604_s1 + $0x28] sm:$0xf]  ;;  %v1387_v13 = vld [vmem:[%s1604_s1 + $0x2c] sm:$0xf]  ;;  %v1392_v14 = vld [vmem:[%s1605_s2 + $0x10] sm:$0xff]  ;;  %s1402_s29 = scalar_lea.vmem %s1603_s0, %s927_s14 }
  0x19   : > { %v1397_v15 = vld [vmem:[%s1605_s2 + $0x18] sm:$0xff]  ;;  %v1407_v16 = vld [vmem:[%s1605_s2 + $0x20] sm:$0xff]  ;;  %v1412_v17 = vld [vmem:[%s1605_s2 + $0x28] sm:$0xff] }
  0x1a   : > { %v1417_v18 = vld [vmem:[%s1605_s2 + $0x30] sm:$0xff]  ;;  %v1422_v19 = vld [vmem:[%s1605_s2 + $0x38] sm:$0xff]  ;;  %v1427_v20 = vld [vmem:[%s1605_s2 + $0x40] sm:$0xff] }
  0x1b   : > { %v1432_v21 = vld [vmem:[%s1605_s2 + $0x48] sm:$0xff]  ;;  %v1437_v22 = vld [vmem:[%s1605_s2 + $0x50] sm:$0xff]  ;;  %v1442_v23 = vld [vmem:[%s1605_s2 + $0x58] sm:$0xff] }
  0x1c   : > { %v1447_v24 = vld [vmem:[%s1606_s3] sm:$0xf] }
  0x1d   : > { %v1452_v25 = vld [vmem:[%s1607_s4] sm:$0xff] }
  0x1e LB: >> { %v929_v26 = vcombine.low %v1320_v0, %v1325_v1  ;;  %vm461_vm0 = vcmask 64512   ;;  %s928_s28 = sshll.u32 %s1207_s18, 3  ;;  %v1209_v27 = vmov 0   ;;  %vm480_vm1 = vcmask 1043456   ;;  %s366_s18 = sadd.s32 1, %s1207_s18   ;;  %s1207_s18 = sphi %s1456_s18, %s366_s18  }
  0x1f   : >> { %s368_s27 = scalar_lea.vmem %s1402_s29, %s928_s28  ;;  %1093 = vset.pattern.permute.xlu0 %v1209_v27  ;;  %1094 = vset.pattern.permute.xlu1 %v1209_v27  ;;  %v930_v31 = vcombine.low %v1332_v2, %v1337_v3  ;;  %v931_v32 = vcombine.low %v1342_v4, %v1347_v5  ;;  %v932_v33 = vcombine.low %v1357_v7, %v1362_v8  ;;  %v1210_v36 = vmov 0.0   ;;  %s649_s22 = scalar_lea.vmem [#allocation2], %s928_s28 }
  0x20   : >> { %986 = vmatprep.mubr.msk.bf16.mxu0 %vm461_vm0, %v929_v26  ;;  %v1468_v28 = vld [vmem:[%s368_s27] sm:$0xff]  ;;  %423 = vperm.xlu0 %1093, %v1437_v22   ;;  %v933_v34 = vcombine.low %v1372_v10, %v1377_v11  ;;  %v934_v35 = vcombine.low %v1382_v12, %v1387_v13  ;;  %vm1211_vm2 = vmmov 0   ;;  %vm600_vm3 = vcmask 785408   ;;  %p363_p11 = scmp.ge.s32.totalorder %s366_s18, 2  }
  0x21   : >> { %413 = vperm.xlu1 %1094, %v1427_v20   ;;  %v370_v29 = vpack.c.bf16 %v1468_v28, %v1468_v28  ;;  %998 = vmatprep.subr.bf16.mxu1 %v1210_v36  ;;  %vm650_vm4 = vcmask 261120   ;;  %vm1213_vm5 = vmmov (%p363_p11), 0   ;;  %v1125_v0 = vld [vmem:[%s1610_s7 + $0x28] sm:$0xff] (%p363_p11)   ;;  %v1126_v1 = vld [vmem:[%s1610_s7 + $0x20] sm:$0xff] (%p363_p11)   ;;  %v1127_v2 = vld [vmem:[%s1610_s7 + $0x18] sm:$0xff] (%p363_p11)   ;;  %s959_s18 = sshll.u32 (%p363_p11), %s1288_s13, 8 }
  0x22   : >> { %1010 = vmatprep.mubr.msk.bf16.mxu1 %vm1211_vm2, %v1210_v36  ;;  %v1128_v3 = vld [vmem:[%s1610_s7 + $0x10] sm:$0xff] (%p363_p11)   ;;  %v1129_v4 = vld [vmem:[%s1610_s7 + $0x8] sm:$0xff] (%p363_p11)   ;;  %v1130_v5 = vld [vmem:[%s1610_s7] sm:$0xff] (%p363_p11)   ;;  %s850_s28 = sshll.u32 (%p363_p11), %s1454_s26, 4  ;;  %s1555_s16 = scalar_lea.hbm (%p363_p11), %s1612_s9, %s959_s18  ;;  %s1557_s28 = int_to_ptr.vmem [resolvable:$true] %s850_s28 }
  0x23   : >> { %1038 = vmatprep.subr.msk.bf16.mxu0 %vm480_vm1, %v370_v29  ;;  %v482_v30 = vsel %vm480_vm1, %v370_v29, 0  ;;  %s1617_s17 = sand.u32 (%p363_p11), 1, %s1195_s10   ;;  %s1139_s13 = scalar_lea.vmem (%p363_p11), %s1557_s28, 256 }
  0x24   : >> { %985 = vmatpush3.bf16.msra.mxu0 %v482_v30  ;;  %428 = vperm.xlu0 %1093, %v1442_v23   ;;  %s1563_s23 = scalar_lea.sflag (%p363_p11), [#allocation4], %s1617_s17  ;;  %p1140_p12 = scmp.ne.s32.totalorder (%p363_p11), %s1557_s28, %s1139_s13 }
  0x25   : >> { %418 = vperm.xlu1 %1094, %v1432_v21   ;;  %s1214_s24 = smov (%p363_p11), [#allocation3]  }
  0x26   : > { %p1141_p13 = pnand (%p363_p11), %p1140_p12, %p1305_p5  ;;  %s1143_s29 = sshll.u32 (%p363_p11), %s1214_s24, 4  ;;  %s1144_s29 = int_to_ptr.vmem [resolvable:$false] %s1143_s29 }
  0x27   : >> { %987 = vmatmul.mubr.msk.bf16.vlgmr.msra.gmra.mxu0 %vm461_vm0, %v930_v31  ;;  %s1145_s21 = scalar_lea.vmem (%p363_p11), %s1144_s29, 512  ;;  %p1146_p1 = scmp.lt.s32.totalorder (%p363_p11), %s1557_s28, %s1144_s29 }
  0x28   : >> { %990 = vmatprep.mubr.msk.bf16.mxu0 %vm461_vm0, %v931_v32  ;;  %403 = vperm.xlu0 %1093, %v1417_v18   ;;  %v946_v18 = vld [vmem:[%s1611_s8] ss:$0 sm:$0xff] (%p363_p11)  ;;  %p1142_p0 = pneg (%p363_p11), %p1141_p13  ;;  %p1147_p2 = scmp.lt.s32.totalorder (%p363_p11), %s1145_s21, %s1139_s13 }
  0x29   : >> { %408 = vperm.xlu1 %1094, %v1422_v19  }
  0x2a   : > { %p1148_p3 = por (%p363_p11), %p1147_p2, %p1146_p1 }
  0x2c   : >> { %393 = vperm.xlu0 %1093, %v1407_v16   ;;  %p1149_p4 = pnand (%p363_p11), %p1148_p3, %p1142_p0 }
  0x2d   : >> { %398 = vperm.xlu1 %1094, %v1412_v17  }
  0x2f   : >> { %991 = vmatmul.mubr.msk.bf16.gmra.mxu0 %vm461_vm0, %v932_v33 }
  0x30   : >> { %994 = vmatprep.mubr.msk.bf16.mxu0 %vm461_vm0, %v933_v34  ;;  %383 = vperm.xlu0 %1093, %v1392_v14  }
  0x31   : >> { %388 = vperm.xlu1 %1094, %v1397_v15  }
  0x34   : >> { %373 = vperm.xlu0 %1093, %v1352_v6   ;;  %v942_v6 = vld [vmem:[%s1609_s6] ss:$0 sm:$0xff] (%p363_p11) }
  0x35   : >> { %378 = vperm.xlu1 %1094, %v1367_v9  }
  0x37   : >> { %995 = vmatmul.mubr.msk.bf16.gmra.mxu0 %vm461_vm0, %v934_v35 }
  0x38   : >> { %597 = vperm.xlu0 %1093, %v1452_v25  }
  0x9b   : >> { %v424_v40 = vpop.permute.xlu0 %423 }
  0x9c   : >> { %v414_v38 = vpop.permute.xlu1 %413 }
  0x9f   : >> { %v429_v45 = vpop.permute.xlu0 %428 }
  0xa0   : >> { %v419_v43 = vpop.permute.xlu1 %418 }
  0xa3   : >> { %v404_v50 = vpop.permute.xlu0 %403 }
  0xa4   : >> { %v409_v48 = vpop.permute.xlu1 %408 }
  0xa7   : >> { %v394_v59 = vpop.permute.xlu0 %393 }
  0xa8   : >> { %v399_v54 = vpop.permute.xlu1 %398 }
  0xab   : >> { %v384_v33 = vpop.permute.xlu0 %383 }
  0xac   : >> { %v389_v30 = vpop.permute.xlu1 %388 }
  0xe7   : >> { %v988_v37 = vpop.f32.mrf.mxu0 }
  0xe9   : >> { %v518_v39 = vpop.f32.mrf.mxu0 }
  0xeb   : >> { %v989_v41 = vpop.f32.mrf.mxu0 }
  0xed   : >> { %v521_v42 = vpop.f32.mrf.mxu0 }
  0xef   : >> { %v992_v44 = vpop.f32.mrf.mxu0 }
  0xf0   : >> { %v543_v26 = vadd.f32 %v992_v44, %v404_v50 }
  0xf1   : >> { %v534_v46 = vpop.f32.mrf.mxu0 }
  0xf2   : >> { %v571_v34 = vmul.f32 2.0, %v543_v26  ;;  %v535_v35 = vadd.f32 %v534_v46, %v394_v59 }
  0xf3   : >> { %v993_v47 = vpop.f32.mrf.mxu0 }
  0xf4   : >> { %v546_v61 = vadd.f32 %v993_v47, %v409_v48  ;;  %v527_v47 = vadd.f32 %v988_v37, %v384_v33  ;;  %v374_v48 = vpop.permute.xlu0 %373 }
  0xf5   : >> { %v537_v49 = vpop.f32.mrf.mxu0 }
  0xf6   : >> { %v572_v31 = vmul.f32 2.0, %v546_v61  ;;  %v538_v32 = vadd.f32 %v537_v49, %v399_v54 }
  0xf7   : >> { %v996_v51 = vpop.f32.mrf.mxu0 }
  0xf8   : >> { %v559_v52 = vadd.f32 %v996_v51, %v424_v40  ;;  %v570_v40 = vmul.f32 2.0, %v538_v32 }
  0xf9   : >> { %v550_v53 = vpop.f32.mrf.mxu0 }
  0xfa   : >> { %v575_v55 = vmul.f32 2.0, %v559_v52  ;;  %v551_v57 = vadd.f32 %v550_v53, %v414_v38  ;;  %v530_v38 = vadd.f32 %v989_v41, %v389_v30  ;;  %v567_v52 = vmul.f32 2.0, %v527_v47  ;;  %v598_v30 = vpop.permute.xlu0 %597 }
  0xfb   : >> { %v997_v56 = vpop.f32.mrf.mxu0  ;;  %v519_v53 = vadd.f32 %v518_v39, %v374_v48  ;;  %v1212_v48 = vmov (%p363_p11), 0.0  }
  0xfc   : >> { %v562_v58 = vadd.f32 %v997_v56, %v429_v45  ;;  %1095 = vtanh.f32 %v575_v55  ;;  %v573_v27 = vmul.f32 2.0, %v551_v57  ;;  %v379_v45 = vpop.permute.xlu1 %378  ;;  %v568_v44 = vmul.f32 2.0, %v530_v38  ;;  %1014 = vmatprep.subr.bf16.mxu0 (%p363_p11), %v1212_v48  ;;  %1018 = vmatprep.mubr.msk.bf16.mxu0 (%p363_p11), %vm1213_vm5, %v1212_v48 }
  0xfd   : >> { %v553_v60 = vpop.f32.mrf.mxu0  ;;  %v522_v50 = vadd.f32 %v521_v42, %v379_v45  ;;  %v565_v41 = vmul.f32 2.0, %v519_v53 }
  0xfe   : >> { %v576_v62 = vmul.f32 2.0, %v562_v58  ;;  %v554_v63 = vadd.f32 %v553_v60, %v419_v43  ;;  %v569_v43 = vmul.f32 2.0, %v535_v35 }
  0xff   : >> { %v566_v54 = vmul.f32 2.0, %v522_v50 }
 0x100   : >> { %1097 = vtanh.f32 %v576_v62  ;;  %v574_v29 = vmul.f32 2.0, %v554_v63 }
 0x102   : >> { %1099 = vtanh.f32 %v574_v29 }
 0x103   : >> { %1101 = vtanh.f32 %v573_v27 }
 0x104   : >> { %1103 = vtanh.f32 %v572_v31 }
 0x105   : >> { %1105 = vtanh.f32 %v571_v34 }
 0x106   : >> { %1107 = vtanh.f32 %v570_v40 }
 0x107   : >> { %1109 = vtanh.f32 %v569_v43  ;;  %v1123_v43 = vld [vmem:[%s1608_s5 + $0x8] sm:$0xff] (%p363_p11)  }
 0x108   : >> { %1111 = vtanh.f32 %v568_v44  ;;  %1015 = vmatpush3.bf16.msra.mxu0 (%p363_p11), %v1123_v43 }
 0x109   : >> { %v1096_v51 = vpop.eup %1095  ;;  %1113 = vtanh.f32 %v567_v52  ;;  %1016 = vmatprep.subr.bf16.mxu0 (%p363_p11), %v1212_v48 }
 0x10a   : >> { %1115 = vtanh.f32 %v566_v54 }
 0x10b   : >> { %1117 = vtanh.f32 %v565_v41 }
 0x10d   : >> { %v1098_v49 = vpop.eup %1097 }
 0x10e   : >> { %v594_v46 = vpack.c.bf16 %v1098_v49, %v1096_v51 }
 0x10f   : >> { %v1100_v55 = vpop.eup %1099 }
 0x110   : >> { %999 = vmatpush3.bf16.msra.mxu1 %v594_v46  ;;  %v1102_v56 = vpop.eup %1101 }
 0x111   : >> { %1000 = vmatprep.subr.bf16.mxu1 %v1210_v36  ;;  %v593_v37 = vpack.c.bf16 %v1100_v55, %v1102_v56  ;;  %v1104_v57 = vpop.eup %1103 }
 0x112   : >> { %v1106_v42 = vpop.eup %1105 }
 0x113   : >> { %v592_v39 = vpack.c.bf16 %v1104_v57, %v1106_v42  ;;  %v1108_v58 = vpop.eup %1107 }
 0x114   : >> { %1001 = vmatpush3.bf16.msra.mxu1 %v593_v37  ;;  %v1110_v59 = vpop.eup %1109 }
 0x115   : >> { %1002 = vmatprep.subr.bf16.mxu1 %v1210_v36  ;;  %v591_v60 = vpack.c.bf16 %v1108_v58, %v1110_v59  ;;  %v1112_v61 = vpop.eup %1111 }
 0x116   : >> { %v1114_v62 = vpop.eup %1113 }
 0x117   : >> { %v590_v63 = vpack.c.bf16 %v1112_v61, %v1114_v62  ;;  %v1116_v26 = vpop.eup %1115 }
 0x118   : >> { %1003 = vmatpush3.bf16.msra.mxu1 %v592_v39  ;;  %v1118_v27 = vpop.eup %1117 }
 0x119   : >> { %1004 = vmatprep.subr.bf16.mxu1 %v1210_v36  ;;  %v589_v29 = vpack.c.bf16 %v1116_v26, %v1118_v27 }
 0x11c   : >> { %1005 = vmatpush3.bf16.msra.mxu1 %v591_v60 }
 0x11d   : >> { %1006 = vmatprep.subr.bf16.mxu1 %v1210_v36 }
 0x120   : >> { %1007 = vmatpush3.bf16.msra.mxu1 %v590_v63 }
 0x121   : >> { %1008 = vmatprep.subr.bf16.mxu1 %v1210_v36 }
 0x124   : >> { %1009 = vmatpush3.bf16.msra.mxu1 %v589_v29 }
 0x125   : > { %1022 = vmatprep.subr.bf16.mxu1 (%p363_p11), %v1212_v48 }
 0x127   : >> { %1011 = vmatmul.mubr.msk.bf16.vlgmr.msra.gmra.mxu1 %vm600_vm3, %v1447_v24 }
 0x128   : > { %1034 = vmatprep.mubr.msk.bf16.mxu1 (%p363_p11), %vm1213_vm5, %v1212_v48  ;;  %1023 = vmatpush3.bf16.msra.mxu1 (%p363_p11), %v1125_v0 }
 0x129   : > { %1024 = vmatprep.subr.bf16.mxu1 (%p363_p11), %v1212_v48 }
 0x12c   : > { %1025 = vmatpush3.bf16.msra.mxu1 (%p363_p11), %v1126_v1 }
 0x12d   : > { %1026 = vmatprep.subr.bf16.mxu1 (%p363_p11), %v1212_v48 }
 0x130   : > { %1027 = vmatpush3.bf16.msra.mxu1 (%p363_p11), %v1127_v2 }
 0x131   : > { %1028 = vmatprep.subr.bf16.mxu1 (%p363_p11), %v1212_v48 }
 0x134   : > { %1029 = vmatpush3.bf16.msra.mxu1 (%p363_p11), %v1128_v3 }
 0x135   : > { %1030 = vmatprep.subr.bf16.mxu1 (%p363_p11), %v1212_v48 }
 0x138   : > { %1031 = vmatpush3.bf16.msra.mxu1 (%p363_p11), %v1129_v4 }
 0x139   : > { %1032 = vmatprep.subr.bf16.mxu1 (%p363_p11), %v1212_v48 }
 0x13c   : > { %1033 = vmatpush3.bf16.msra.mxu1 (%p363_p11), %v1130_v5 }
 0x1e7   : >> { %v638_v31 = vpop.f32.mrf.mxu1 }
 0x1e8   : >> { %v639_v32 = vadd.f32 %v638_v31, %v598_v30 }
 0x1e9   : >> { %v1012_v33 = vpop.f32.mrf.mxu1 }
 0x1ea   : >> { %v644_v34 = vmul.f32 2.0, %v639_v32 }
 0x1eb   : >> { %v641_v35 = vpop.f32.mrf.mxu1 }
 0x1ec   : >> { %1119 = vtanh.f32 %v644_v34 }
 0x1ed   : >> { %v1013_v38 = vpop.f32.mrf.mxu1 }
 0x1f9   : >> { %v1120_v40 = vpop.eup %1119 }
 0x1fa   : >> { %v646_v45 = vadd.f32 %v1120_v40, %v1468_v28  ;;  %v1124_v28 = vld [vmem:[%s1608_s5] sm:$0xff] (%p363_p11)  }
 0x1fb   : > { %1017 = vmatpush3.bf16.msra.mxu0 (%p363_p11), %v1124_v28 }
 0x1fc   : >> { %v647_v47 = vmul.f32 2.0, %v646_v45 }
 0x1fe   : >> { %1121 = vtanh.f32 %v647_v47 }
 0x208   : > { %365 = sbr.rel (!%p363_p11) target bundleno = 30 (0x1e), region = 100 }
 0x20b   : >> { %v1122_v36 = vpop.eup %1121 }
 0x20c   : >> { %651 = vst.msk [vmem:[%s649_s22] sm:$0xff] %vm650_vm4, %v1122_v36 }
 0x213   : > { %v652_v44 = vld [vmem:[#allocation2] sm:$0xff]  ;;  %v653_v50 = vld [vmem:[#allocation2 + $0x8] sm:$0xff] }
 0x214   : > { %v654_v51 = vpack.c.bf16 %v653_v50, %v652_v44 }
 0x216   : > { %1019 = vmatmul.mubr.msk.bf16.vlgmr.msra.gmra.mxu0 %vm650_vm4, %v654_v51 }
 0x2d6   : > { %v716_v7 = vpop.f32.mrf.mxu0 }
 0x2d7   : > { %v717_v8 = vadd.f32 %v942_v6, %v716_v7 }
 0x2d8   : > { %v1020_v9 = vpop.f32.mrf.mxu0 }
 0x2d9   : > { %v723_v10 = vmul.f32 2.0, %v717_v8 }
 0x2da   : > { %v719_v11 = vpop.f32.mrf.mxu0 }
 0x2db   : > { %v720_v12 = vadd.f32 %v942_v6, %v719_v11  ;;  %1131 = vtanh.f32 %v723_v10 }
 0x2dc   : > { %v1021_v13 = vpop.f32.mrf.mxu0 }
 0x2dd   : > { %v724_v14 = vmul.f32 2.0, %v720_v12 }
 0x2df   : > { %1133 = vtanh.f32 %v724_v14 }
 0x2e8   : > { %v1132_v15 = vpop.eup %1131 }
 0x2ec   : > { %v1134_v16 = vpop.eup %1133 }
 0x2ed   : > { %v727_v17 = vpack.c.bf16 %v1134_v16, %v1132_v15 }
 0x2ef   : > { %1035 = vmatmul.mubr.msk.bf16.vlgmr.msra.gmra.mxu1 %vm600_vm3, %v727_v17 }
 0x3af   : > { %v821_v19 = vpop.f32.mrf.mxu1 }
 0x3b0   : > { %v822_v20 = vadd.f32 %v946_v18, %v821_v19 }
 0x3b1   : > { %v1036_v21 = vpop.f32.mrf.mxu1 }
 0x3b2   : > { %v828_v22 = vadd.f32 %v822_v20, %v652_v44 }
 0x3b3   : > { %v824_v23 = vpop.f32.mrf.mxu1 }
 0x3b4   : > { %v830_v24 = vmul.f32 2.0, %v828_v22  ;;  %v825_v25 = vadd.f32 %v946_v18, %v824_v23 }
 0x3b5   : > { %v1037_v52 = vpop.f32.mrf.mxu1 }
 0x3b6   : > { %1135 = vtanh.f32 %v830_v24  ;;  %v829_v53 = vadd.f32 %v825_v25, %v653_v50 }
 0x3b8   : > { %v831_v49 = vmul.f32 2.0, %v829_v53 }
 0x3ba   : > { %1137 = vtanh.f32 %v831_v49 }
 0x3c3   : > { %v1136_v54 = vpop.eup %1135 }
 0x3c4   : > { %834 = vst.msk [vmem:[%s1454_s26] sm:$0xff] %vm650_vm4, %v1136_v54 }
 0x3c7   : > { %v1138_v46 = vpop.eup %1137 }
 0x3c8   : > { %835 = vst.msk [vmem:[%s1454_s26 + $0x8] sm:$0xff] %vm650_vm4, %v1138_v46 }
 0x3c9   : > { %1152 = shalt.err (!%p1149_p4)
}
 0x3ca   : > { %s1153_s26 = scalar_lea.hbm %s1555_s16, 256  ;;  %s1157_s18 = scalar_lea.hbm %s1612_s9, 512 }
 0x3cb   : > { %p1154_p7 = scmp.ne.s32.totalorder %s1555_s16, %s1153_s26  ;;  %p1158_p10 = scmp.lt.s32.totalorder %s1555_s16, %s1612_s9 }
 0x3cc   : > { %p1159_p11 = scmp.lt.s32.totalorder %s1157_s18, %s1153_s26 }
 0x3cd   : > { %p1155_p8 = pnand %p1154_p7, %p1305_p5 }
 0x3ce   : > { %p1160_p12 = por %p1159_p11, %p1158_p10 }
 0x3cf   : > { %p1156_p9 = pneg %p1155_p8 }
 0x3d1   : > { %p1161_p13 = pnand %p1160_p12, %p1156_p9 }
 0x3d3   : > { %1164 = shalt.err (!%p1161_p13)
}
 0x3d4   : > { %s1215_s17 = smov 128   ;;  %s1216_s13 = smov 8  }
 0x3d5   : > { %1039 = dma.vmem_to_hbm [thread:$0]  (%p1305_p5), %s1557_s28, 256, %s1555_s16, %s1563_s23, %s1215_s17, %s1215_s17, %s1216_s13  }
 0x3d6 PF: > { %p1045_p0 = scmp.ge.s32.totalorder %s1203_s12, 2  ;;  %s865_s24 = sand.u32 1, %s1191_s30  }
 0x3d7   : > { %s866_s29 = scalar_lea.sflag [#allocation4], %s865_s24 }
 0x3d8   : > { %p1042_p1 = pnand %p1045_p0, %p1309_p6 }
 0x3da   : > { %p1043_p2 = pneg %p1042_p1 }
 0x3dc   : > { %1186 = dma.done.wait (%p1043_p2), %s866_s29, 256  }
 0x3dd   : > { %1188 = vsyncadd (%p1043_p2), %s866_s29, 4294967040  ;;  %s1618_s21 = sld [smem:[#allocation6_spill]]  ;;  %p19_p3 = scmp.ge.s32.totalorder %s1292_s15, 4  }
 0x3de   : > { %s1619_s30 = smov %s1195_s10  ;;  %s1620_s10 = smov %s1199_s11 }
 0x3df   : > { %s1622_s12 = smov %s1292_s15  ;;  %21 = sbr.rel (!%p19_p3) target bundleno = 3 (0x3), region = 111 }
 0x3e3   : > { %s1621_s11 = smov %s1618_s21 }
 0x3e4   :  { %871 = vsyncpa [#allocation4], 1 }
 0x3e5   :  { %873 = vsyncpa [#allocation4 + $0x1], 1 }

// kernel: bitmixer_forward.2
= control target key start
LH: loop header
LB: loop body
LE: loop exit
PB: predicated region body
PF: predicated region fallthrough
CT: control target
= control target key end

     0   :  { %s1157_s30 = smov 0   ;;  %s1404_s0 = inlined_call_operand.vmem [shape: f32[4,8,32], index: 0, kind: input, shape index: {}]   ;;  %s1405_s1 = inlined_call_operand.vmem [shape: bf16[96,8], index: 1, kind: input, shape index: {}]   ;;  %s1406_s2 = inlined_call_operand.vmem [shape: f32[96,1], index: 2, kind: input, shape index: {}]   ;;  %s1407_s3 = inlined_call_operand.vmem [shape: bf16[8,96], index: 3, kind: input, shape index: {}]   ;;  %s1408_s4 = inlined_call_operand.vmem [shape: f32[8,1], index: 4, kind: input, shape index: {}]   ;;  %s1409_s5 = inlined_call_operand.vmem [shape: bf16[32,96], index: 5, kind: input, shape index: {}]   ;;  %s1410_s6 = inlined_call_operand.vmem [shape: f32[1,96], index: 6, kind: input, shape index: {}]   ;;  %s1411_s7 = inlined_call_operand.vmem [shape: bf16[96,32], index: 7, kind: input, shape index: {}]   ;;  %s1412_s8 = inlined_call_operand.vmem [shape: f32[1,32], index: 8, kind: input, shape index: {}]   ;;  %s1413_s9 = inlined_call_operand.vmem [shape: f32[4,8,32], index: 9, kind: output, shape index: {}]  }
   0x1 LB: > { %s903_s10 = sadd.s32 4294967295, %s1096_s30   ;;  %p907_p0 = scmp.ge.s32.totalorder %s1096_s30, 1  ;;  %s1096_s30 = sphi %s1157_s30, %s19_s30  }
   0x2   : > { %p288_p1 = scmp.lt.s32.totalorder %s1096_s30, 3 }
   0x4   : > { %p289_p2 = pnand %p907_p0, %p288_p1 }
   0x5   : > { %s908_s11 = sshll.u32 (!%p289_p2), %s903_s10, 1 }
   0x6   : > { %292 = sbr.rel (%p289_p2) target bundleno = 960 (0x3c0), region = 56  ;;  %p325_p3 = scmp.lt.s32.totalorder (!%p289_p2), %s908_s11, 3 }
   0xb   : > { %v1168_v0 = vld [vmem:[%s1405_s1] sm:$0xf]  ;;  %v1173_v1 = vld [vmem:[%s1405_s1 + $0x4] sm:$0xf]  ;;  %v1183_v3 = vld [vmem:[%s1405_s1 + $0x8] sm:$0xf] }
   0xc   : > { %v1178_v2 = vld [vmem:[%s1406_s2] sm:$0xff]  ;;  %v1188_v4 = vld [vmem:[%s1405_s1 + $0xc] sm:$0xf]  ;;  %v1198_v6 = vld [vmem:[%s1405_s1 + $0x10] sm:$0xf]  ;;  %s1415_s11 = smov (!%p325_p3, %s908_s11), 3 }
   0xd   : > { %v1193_v5 = vld [vmem:[%s1406_s2 + $0x8] sm:$0xff]  ;;  %v1203_v7 = vld [vmem:[%s1405_s1 + $0x14] sm:$0xf]  ;;  %v1208_v8 = vld [vmem:[%s1405_s1 + $0x18] sm:$0xf]  ;;  %s909_s23 = sshll.u32 %s1415_s11, 3 }
   0xe   : > { %v1213_v9 = vld [vmem:[%s1405_s1 + $0x1c] sm:$0xf]  ;;  %v1218_v10 = vld [vmem:[%s1405_s1 + $0x20] sm:$0xf]  ;;  %v1223_v11 = vld [vmem:[%s1406_s2 + $0x10] sm:$0xff]  ;;  %s1258_s13 = scalar_lea.vmem %s1404_s0, %s909_s23  ;;  %s1263_s15 = scalar_lea.vmem %s1413_s9, %s909_s23 }
   0xf   : > { %v1228_v12 = vld [vmem:[%s1405_s1 + $0x24] sm:$0xf]  ;;  %v1233_v13 = vld [vmem:[%s1405_s1 + $0x28] sm:$0xf]  ;;  %v1238_v14 = vld [vmem:[%s1405_s1 + $0x2c] sm:$0xf] }
  0x10   : > { %v1243_v15 = vld [vmem:[%s1406_s2 + $0x18] sm:$0xff]  ;;  %v1248_v16 = vld [vmem:[%s1406_s2 + $0x20] sm:$0xff]  ;;  %v1253_v17 = vld [vmem:[%s1406_s2 + $0x28] sm:$0xff]  ;;  %s1305_s11 = smov 0  }
  0x11   : > { %v1268_v18 = vld [vmem:[%s1406_s2 + $0x30] sm:$0xff]  ;;  %v1273_v19 = vld [vmem:[%s1406_s2 + $0x38] sm:$0xff]  ;;  %v1278_v20 = vld [vmem:[%s1406_s2 + $0x40] sm:$0xff] }
  0x12   : > { %v1283_v21 = vld [vmem:[%s1406_s2 + $0x48] sm:$0xff]  ;;  %v1288_v22 = vld [vmem:[%s1406_s2 + $0x50] sm:$0xff]  ;;  %v1293_v23 = vld [vmem:[%s1406_s2 + $0x58] sm:$0xff] }
  0x13   : > { %v1298_v24 = vld [vmem:[%s1407_s3] sm:$0xf] }
  0x14   : > { %v1303_v25 = vld [vmem:[%s1408_s4] sm:$0xff] }
  0x15 LB: >> { %v913_v26 = vcombine.low %v1168_v0, %v1173_v1  ;;  %vm463_vm0 = vcmask 64512   ;;  %s912_s14 = sshll.u32 %s1100_s11, 3  ;;  %v1102_v27 = vmov 0   ;;  %vm482_vm1 = vcmask 1043456   ;;  %s368_s11 = sadd.s32 1, %s1100_s11   ;;  %s1100_s11 = sphi %s1305_s11, %s368_s11  }
  0x16   : >> { %s370_s16 = scalar_lea.vmem %s1258_s13, %s912_s14  ;;  %1040 = vset.pattern.permute.xlu0 %v1102_v27  ;;  %1041 = vset.pattern.permute.xlu1 %v1102_v27  ;;  %v914_v31 = vcombine.low %v1183_v3, %v1188_v4  ;;  %v915_v32 = vcombine.low %v1198_v6, %v1203_v7  ;;  %v916_v33 = vcombine.low %v1208_v8, %v1213_v9  ;;  %v1103_v36 = vmov 0.0   ;;  %s651_s17 = scalar_lea.vmem [#allocation2], %s912_s14 }
  0x17   : >> { %966 = vmatprep.mubr.msk.bf16.mxu0 %vm463_vm0, %v913_v26  ;;  %v1317_v28 = vld [vmem:[%s370_s16] sm:$0xff]  ;;  %425 = vperm.xlu0 %1040, %v1288_v22   ;;  %v917_v34 = vcombine.low %v1218_v10, %v1228_v12  ;;  %v918_v35 = vcombine.low %v1233_v13, %v1238_v14  ;;  %vm1104_vm2 = vmmov 0   ;;  %vm602_vm3 = vcmask 785408   ;;  %p365_p4 = scmp.ge.s32.totalorder %s368_s11, 2  }
  0x18   : >> { %415 = vperm.xlu1 %1041, %v1278_v20   ;;  %v372_v29 = vpack.c.bf16 %v1317_v28, %v1317_v28  ;;  %978 = vmatprep.subr.bf16.mxu1 %v1103_v36  ;;  %vm652_vm4 = vcmask 261120   ;;  %vm1106_vm5 = vmmov (%p365_p4), 0   ;;  %v1072_v0 = vld [vmem:[%s1411_s7 + $0x28] sm:$0xff] (%p365_p4)   ;;  %v1073_v1 = vld [vmem:[%s1411_s7 + $0x20] sm:$0xff] (%p365_p4)   ;;  %v1075_v3 = vld [vmem:[%s1411_s7 + $0x10] sm:$0xff] (%p365_p4)  }
  0x19   : >> { %990 = vmatprep.mubr.msk.bf16.mxu1 %vm1104_vm2, %v1103_v36  ;;  %v1076_v4 = vld [vmem:[%s1411_s7 + $0x8] sm:$0xff] (%p365_p4)   ;;  %v926_v6 = vld [vmem:[%s1410_s6] ss:$0 sm:$0xff] (%p365_p4) }
  0x1a   : >> { %1018 = vmatprep.subr.msk.bf16.mxu0 %vm482_vm1, %v372_v29  ;;  %v484_v30 = vsel %vm482_vm1, %v372_v29, 0 }
  0x1b   : >> { %965 = vmatpush3.bf16.msra.mxu0 %v484_v30  ;;  %430 = vperm.xlu0 %1040, %v1293_v23  }
  0x1c   : >> { %420 = vperm.xlu1 %1041, %v1283_v21  }
  0x1e   : >> { %967 = vmatmul.mubr.msk.bf16.vlgmr.msra.gmra.mxu0 %vm463_vm0, %v914_v31 }
  0x1f   : >> { %970 = vmatprep.mubr.msk.bf16.mxu0 %vm463_vm0, %v915_v32  ;;  %405 = vperm.xlu0 %1040, %v1268_v18   ;;  %v930_v18 = vld [vmem:[%s1412_s8] ss:$0 sm:$0xff] (%p365_p4) }
  0x20   : >> { %410 = vperm.xlu1 %1041, %v1273_v19  }
  0x23   : >> { %395 = vperm.xlu0 %1040, %v1248_v16  }
  0x24   : >> { %400 = vperm.xlu1 %1041, %v1253_v17  }
  0x26   : >> { %971 = vmatmul.mubr.msk.bf16.gmra.mxu0 %vm463_vm0, %v916_v33 }
  0x27   : >> { %974 = vmatprep.mubr.msk.bf16.mxu0 %vm463_vm0, %v917_v34  ;;  %385 = vperm.xlu0 %1040, %v1223_v11  }
  0x28   : >> { %390 = vperm.xlu1 %1041, %v1243_v15  }
  0x2b   : >> { %375 = vperm.xlu0 %1040, %v1178_v2   ;;  %v1074_v2 = vld [vmem:[%s1411_s7 + $0x18] sm:$0xff] (%p365_p4)  }
  0x2c   : >> { %380 = vperm.xlu1 %1041, %v1193_v5   ;;  %v1077_v5 = vld [vmem:[%s1411_s7] sm:$0xff] (%p365_p4)  }
  0x2e   : >> { %975 = vmatmul.mubr.msk.bf16.gmra.mxu0 %vm463_vm0, %v918_v35 }
  0x2f   : >> { %599 = vperm.xlu0 %1040, %v1303_v25  }
  0x92   : >> { %v426_v40 = vpop.permute.xlu0 %425 }
  0x93   : >> { %v416_v38 = vpop.permute.xlu1 %415 }
  0x96   : >> { %v431_v45 = vpop.permute.xlu0 %430 }
  0x97   : >> { %v421_v43 = vpop.permute.xlu1 %420 }
  0x9a   : >> { %v406_v50 = vpop.permute.xlu0 %405 }
  0x9b   : >> { %v411_v48 = vpop.permute.xlu1 %410 }
  0x9e   : >> { %v396_v59 = vpop.permute.xlu0 %395 }
  0x9f   : >> { %v401_v54 = vpop.permute.xlu1 %400 }
  0xa2   : >> { %v386_v33 = vpop.permute.xlu0 %385 }
  0xa3   : >> { %v391_v30 = vpop.permute.xlu1 %390 }
  0xde   : >> { %v968_v37 = vpop.f32.mrf.mxu0 }
  0xe0   : >> { %v520_v39 = vpop.f32.mrf.mxu0 }
  0xe2   : >> { %v969_v41 = vpop.f32.mrf.mxu0 }
  0xe4   : >> { %v523_v42 = vpop.f32.mrf.mxu0 }
  0xe6   : >> { %v972_v44 = vpop.f32.mrf.mxu0 }
  0xe7   : >> { %v545_v26 = vadd.f32 %v972_v44, %v406_v50 }
  0xe8   : >> { %v536_v46 = vpop.f32.mrf.mxu0 }
  0xe9   : >> { %v573_v34 = vmul.f32 2.0, %v545_v26  ;;  %v537_v35 = vadd.f32 %v536_v46, %v396_v59 }
  0xea   : >> { %v973_v47 = vpop.f32.mrf.mxu0 }
  0xeb   : >> { %v548_v61 = vadd.f32 %v973_v47, %v411_v48  ;;  %v529_v47 = vadd.f32 %v968_v37, %v386_v33  ;;  %v376_v48 = vpop.permute.xlu0 %375 }
  0xec   : >> { %v539_v49 = vpop.f32.mrf.mxu0 }
  0xed   : >> { %v574_v31 = vmul.f32 2.0, %v548_v61  ;;  %v540_v32 = vadd.f32 %v539_v49, %v401_v54 }
  0xee   : >> { %v976_v51 = vpop.f32.mrf.mxu0 }
  0xef   : >> { %v561_v52 = vadd.f32 %v976_v51, %v426_v40  ;;  %v572_v40 = vmul.f32 2.0, %v540_v32 }
  0xf0   : >> { %v552_v53 = vpop.f32.mrf.mxu0 }
  0xf1   : >> { %v577_v55 = vmul.f32 2.0, %v561_v52  ;;  %v553_v57 = vadd.f32 %v552_v53, %v416_v38  ;;  %v532_v38 = vadd.f32 %v969_v41, %v391_v30  ;;  %v569_v52 = vmul.f32 2.0, %v529_v47  ;;  %v600_v30 = vpop.permute.xlu0 %599 }
  0xf2   : >> { %v977_v56 = vpop.f32.mrf.mxu0  ;;  %v521_v53 = vadd.f32 %v520_v39, %v376_v48  ;;  %v1105_v48 = vmov (%p365_p4), 0.0  }
  0xf3   : >> { %v564_v58 = vadd.f32 %v977_v56, %v431_v45  ;;  %1042 = vtanh.f32 %v577_v55  ;;  %v575_v27 = vmul.f32 2.0, %v553_v57  ;;  %v381_v45 = vpop.permute.xlu1 %380  ;;  %v570_v44 = vmul.f32 2.0, %v532_v38  ;;  %994 = vmatprep.subr.bf16.mxu0 (%p365_p4), %v1105_v48  ;;  %998 = vmatprep.mubr.msk.bf16.mxu0 (%p365_p4), %vm1106_vm5, %v1105_v48 }
  0xf4   : >> { %v555_v60 = vpop.f32.mrf.mxu0  ;;  %v524_v50 = vadd.f32 %v523_v42, %v381_v45  ;;  %v567_v41 = vmul.f32 2.0, %v521_v53 }
  0xf5   : >> { %v578_v62 = vmul.f32 2.0, %v564_v58  ;;  %v556_v63 = vadd.f32 %v555_v60, %v421_v43  ;;  %v571_v43 = vmul.f32 2.0, %v537_v35 }
  0xf6   : >> { %v568_v54 = vmul.f32 2.0, %v524_v50 }
  0xf7   : >> { %1044 = vtanh.f32 %v578_v62  ;;  %v576_v29 = vmul.f32 2.0, %v556_v63 }
  0xf9   : >> { %1046 = vtanh.f32 %v576_v29 }
  0xfa   : >> { %1048 = vtanh.f32 %v575_v27 }
  0xfb   : >> { %1050 = vtanh.f32 %v574_v31 }
  0xfc   : >> { %1052 = vtanh.f32 %v573_v34 }
  0xfd   : >> { %1054 = vtanh.f32 %v572_v40 }
  0xfe   : >> { %1056 = vtanh.f32 %v571_v43  ;;  %v1070_v43 = vld [vmem:[%s1409_s5 + $0x8] sm:$0xff] (%p365_p4)  }
  0xff   : >> { %1058 = vtanh.f32 %v570_v44  ;;  %995 = vmatpush3.bf16.msra.mxu0 (%p365_p4), %v1070_v43 }
 0x100   : >> { %v1043_v51 = vpop.eup %1042  ;;  %1060 = vtanh.f32 %v569_v52  ;;  %996 = vmatprep.subr.bf16.mxu0 (%p365_p4), %v1105_v48 }
 0x101   : >> { %1062 = vtanh.f32 %v568_v54 }
 0x102   : >> { %1064 = vtanh.f32 %v567_v41 }
 0x104   : >> { %v1045_v49 = vpop.eup %1044 }
 0x105   : >> { %v596_v46 = vpack.c.bf16 %v1045_v49, %v1043_v51 }
 0x106   : >> { %v1047_v55 = vpop.eup %1046 }
 0x107   : >> { %979 = vmatpush3.bf16.msra.mxu1 %v596_v46  ;;  %v1049_v56 = vpop.eup %1048 }
 0x108   : >> { %980 = vmatprep.subr.bf16.mxu1 %v1103_v36  ;;  %v595_v37 = vpack.c.bf16 %v1047_v55, %v1049_v56  ;;  %v1051_v57 = vpop.eup %1050 }
 0x109   : >> { %v1053_v42 = vpop.eup %1052 }
 0x10a   : >> { %v594_v39 = vpack.c.bf16 %v1051_v57, %v1053_v42  ;;  %v1055_v58 = vpop.eup %1054 }
 0x10b   : >> { %981 = vmatpush3.bf16.msra.mxu1 %v595_v37  ;;  %v1057_v59 = vpop.eup %1056 }
 0x10c   : >> { %982 = vmatprep.subr.bf16.mxu1 %v1103_v36  ;;  %v593_v60 = vpack.c.bf16 %v1055_v58, %v1057_v59  ;;  %v1059_v61 = vpop.eup %1058 }
 0x10d   : >> { %v1061_v62 = vpop.eup %1060 }
 0x10e   : >> { %v592_v63 = vpack.c.bf16 %v1059_v61, %v1061_v62  ;;  %v1063_v26 = vpop.eup %1062 }
 0x10f   : >> { %983 = vmatpush3.bf16.msra.mxu1 %v594_v39  ;;  %v1065_v27 = vpop.eup %1064 }
 0x110   : >> { %984 = vmatprep.subr.bf16.mxu1 %v1103_v36  ;;  %v591_v29 = vpack.c.bf16 %v1063_v26, %v1065_v27 }
 0x113   : >> { %985 = vmatpush3.bf16.msra.mxu1 %v593_v60 }
 0x114   : >> { %986 = vmatprep.subr.bf16.mxu1 %v1103_v36 }
 0x117   : >> { %987 = vmatpush3.bf16.msra.mxu1 %v592_v63 }
 0x118   : >> { %988 = vmatprep.subr.bf16.mxu1 %v1103_v36 }
 0x11b   : >> { %989 = vmatpush3.bf16.msra.mxu1 %v591_v29 }
 0x11c   : > { %1002 = vmatprep.subr.bf16.mxu1 (%p365_p4), %v1105_v48 }
 0x11e   : >> { %991 = vmatmul.mubr.msk.bf16.vlgmr.msra.gmra.mxu1 %vm602_vm3, %v1298_v24 }
 0x11f   : > { %1014 = vmatprep.mubr.msk.bf16.mxu1 (%p365_p4), %vm1106_vm5, %v1105_v48  ;;  %1003 = vmatpush3.bf16.msra.mxu1 (%p365_p4), %v1072_v0 }
 0x120   : > { %1004 = vmatprep.subr.bf16.mxu1 (%p365_p4), %v1105_v48 }
 0x123   : > { %1005 = vmatpush3.bf16.msra.mxu1 (%p365_p4), %v1073_v1 }
 0x124   : > { %1006 = vmatprep.subr.bf16.mxu1 (%p365_p4), %v1105_v48 }
 0x127   : > { %1007 = vmatpush3.bf16.msra.mxu1 (%p365_p4), %v1074_v2 }
 0x128   : > { %1008 = vmatprep.subr.bf16.mxu1 (%p365_p4), %v1105_v48 }
 0x12b   : > { %1009 = vmatpush3.bf16.msra.mxu1 (%p365_p4), %v1075_v3 }
 0x12c   : > { %1010 = vmatprep.subr.bf16.mxu1 (%p365_p4), %v1105_v48 }
 0x12f   : > { %1011 = vmatpush3.bf16.msra.mxu1 (%p365_p4), %v1076_v4 }
 0x130   : > { %1012 = vmatprep.subr.bf16.mxu1 (%p365_p4), %v1105_v48 }
 0x133   : > { %1013 = vmatpush3.bf16.msra.mxu1 (%p365_p4), %v1077_v5 }
 0x1de   : >> { %v640_v31 = vpop.f32.mrf.mxu1 }
 0x1df   : >> { %v641_v32 = vadd.f32 %v640_v31, %v600_v30 }
 0x1e0   : >> { %v992_v33 = vpop.f32.mrf.mxu1 }
 0x1e1   : >> { %v646_v34 = vmul.f32 2.0, %v641_v32 }
 0x1e2   : >> { %v643_v35 = vpop.f32.mrf.mxu1 }
 0x1e3   : >> { %1066 = vtanh.f32 %v646_v34 }
 0x1e4   : >> { %v993_v38 = vpop.f32.mrf.mxu1 }
 0x1f0   : >> { %v1067_v40 = vpop.eup %1066 }
 0x1f1   : >> { %v648_v45 = vadd.f32 %v1067_v40, %v1317_v28  ;;  %v1071_v28 = vld [vmem:[%s1409_s5] sm:$0xff] (%p365_p4)  }
 0x1f2   : > { %997 = vmatpush3.bf16.msra.mxu0 (%p365_p4), %v1071_v28 }
 0x1f3   : >> { %v649_v47 = vmul.f32 2.0, %v648_v45 }
 0x1f5   : >> { %1068 = vtanh.f32 %v649_v47 }
 0x1ff   : > { %367 = sbr.rel (!%p365_p4) target bundleno = 21 (0x15), region = 95 }
 0x202   : >> { %v1069_v36 = vpop.eup %1068 }
 0x203   : >> { %653 = vst.msk [vmem:[%s651_s17] sm:$0xff] %vm652_vm4, %v1069_v36 }
 0x20a   : > { %v654_v44 = vld [vmem:[#allocation2] sm:$0xff]  ;;  %v655_v50 = vld [vmem:[#allocation2 + $0x8] sm:$0xff] }
 0x20b   : > { %v656_v51 = vpack.c.bf16 %v655_v50, %v654_v44 }
 0x20d   : > { %999 = vmatmul.mubr.msk.bf16.vlgmr.msra.gmra.mxu0 %vm652_vm4, %v656_v51 }
 0x2cd   : > { %v718_v7 = vpop.f32.mrf.mxu0 }
 0x2ce   : > { %v719_v8 = vadd.f32 %v926_v6, %v718_v7 }
 0x2cf   : > { %v1000_v9 = vpop.f32.mrf.mxu0 }
 0x2d0   : > { %v725_v10 = vmul.f32 2.0, %v719_v8 }
 0x2d1   : > { %v721_v11 = vpop.f32.mrf.mxu0 }
 0x2d2   : > { %v722_v12 = vadd.f32 %v926_v6, %v721_v11  ;;  %1078 = vtanh.f32 %v725_v10 }
 0x2d3   : > { %v1001_v13 = vpop.f32.mrf.mxu0 }
 0x2d4   : > { %v726_v14 = vmul.f32 2.0, %v722_v12 }
 0x2d6   : > { %1080 = vtanh.f32 %v726_v14 }
 0x2df   : > { %v1079_v15 = vpop.eup %1078 }
 0x2e3   : > { %v1081_v16 = vpop.eup %1080 }
 0x2e4   : > { %v729_v17 = vpack.c.bf16 %v1081_v16, %v1079_v15 }
 0x2e6   : > { %1015 = vmatmul.mubr.msk.bf16.vlgmr.msra.gmra.mxu1 %vm602_vm3, %v729_v17 }
 0x3a6   : > { %v823_v19 = vpop.f32.mrf.mxu1 }
 0x3a7   : > { %v824_v20 = vadd.f32 %v930_v18, %v823_v19 }
 0x3a8   : > { %v1016_v21 = vpop.f32.mrf.mxu1 }
 0x3a9   : > { %v830_v22 = vadd.f32 %v824_v20, %v654_v44 }
 0x3aa   : > { %v826_v23 = vpop.f32.mrf.mxu1 }
 0x3ab   : > { %v832_v24 = vmul.f32 2.0, %v830_v22  ;;  %v827_v25 = vadd.f32 %v930_v18, %v826_v23 }
 0x3ac   : > { %v1017_v52 = vpop.f32.mrf.mxu1 }
 0x3ad   : > { %1082 = vtanh.f32 %v832_v24  ;;  %v831_v53 = vadd.f32 %v827_v25, %v655_v50 }
 0x3af   : > { %v833_v49 = vmul.f32 2.0, %v831_v53 }
 0x3b1   : > { %1084 = vtanh.f32 %v833_v49 }
 0x3ba   : > { %v1083_v54 = vpop.eup %1082 }
 0x3bb   : > { %836 = vst.msk [vmem:[%s1263_s15] sm:$0xff] %vm652_vm4, %v1083_v54 }
 0x3be   : > { %v1085_v46 = vpop.eup %1084 }
 0x3bf   : > { %837 = vst.msk [vmem:[%s1263_s15 + $0x8] sm:$0xff] %vm652_vm4, %v1085_v46 }
 0x3c0 PF: > { %s19_s30 = sadd.s32 1, %s1096_s30  }
 0x3c1   : > { %p16_p5 = scmp.ge.s32.totalorder %s19_s30, 4  }
 0x3c3   :  { %18 = sbr.rel (!%p16_p5) target bundleno = 1 (0x1), region = 106 }

</bundles_post_ra>
